<compile_context>
chip_gen: v7x
topology: tpu7x:2x2x1
jax: 0.10.0
libtpu: 0.0.40
codegen_flags: <defaults>
</compile_context>

<pallas_src>
import functools

import jax
import jax.numpy as jnp
from jax.experimental import pallas as pl
from jax.experimental.pallas import tpu as pltpu


def _round_up(x, m):
    return (x + m - 1) // m * m


# ----------------------------- Pallas kernel ------------------------------ #
def fused_stem_kernel(x_ref, w_ref, shift_ref, fcw_ref, fcb_ref, out_ref, *,
                      chunk_h, n_chunks, out_w, cp, inv_p):
    """Fused conv3x3 (merged-tap matmul) + BN-shift + ReLU + GAP + classifier.

    x_ref    : [1, H+2, W+2, Cp]   bf16 halo-padded whole image
    w_ref    : [9*Cp, Cmid_p]      bf16 conv weight, taps merged into K
                                   (BN scale folded in)
    shift_ref: [1, Cmid_p]         f32  BN shift (beta - mean*scale)
    fcw_ref  : [Cmid_p, Np]        f32/bf16 classifier weight
    fcb_ref  : [1, Np]             f32  classifier bias
    out_ref  : [1, 1, Np]          f32  logits (padded classes)
    """
    rows = chunk_h * out_w
    k_dim = 9 * cp
    c_mid = w_ref.shape[-1]

    w = w_ref[...]            # VMEM-resident, hoisted out of the chunk loop
    shift = shift_ref[...]

    def chunk_body(t, acc):
        r0 = t * chunk_h
        if not isinstance(r0, int):
            r0 = pl.multiple_of(r0, chunk_h)
        # Build the im2col LHS in VMEM: 9 shifted slices concatenated along
        # the channel axis -> one lane-dense K = 9*Cp contraction.
        taps = []
        for di in range(3):
            for dj in range(3):
                taps.append(x_ref[0, pl.ds(r0 + di, chunk_h),
                                  pl.ds(dj, out_w), :])
        lhs = jnp.concatenate(taps, axis=-1)          # [chunk_h, W, 9*Cp] bf16
        lhs = lhs.reshape(rows, k_dim)                # [rows, K]
        y = jnp.dot(lhs, w, preferred_element_type=jnp.float32)
        # BN shift (scale already folded into the weights) + ReLU (VPU, f32).
        y = jnp.maximum(y + shift, 0.0)
        # Running pooled sum; divide by P only once at the end.
        return acc + jnp.sum(y, axis=0, keepdims=True)

    acc0 = jnp.zeros((1, c_mid), jnp.float32)
    if n_chunks == 1:
        acc = chunk_body(0, acc0)
    else:
        acc = jax.lax.fori_loop(0, n_chunks, chunk_body, acc0,
                                unroll=min(n_chunks, 8))

    # TODO(synk): dropout(drop_rate=0.2) is identity in eval mode; omitted.
    pooled = (acc * inv_p).astype(fcw_ref.dtype)                  # [1, Cmid_p]
    logits = jnp.dot(pooled, fcw_ref[...],
                     preferred_element_type=jnp.float32) + fcb_ref[...]
    out_ref[0] = logits


# ------------------------------- wrapper ---------------------------------- #
def model_forward(x_nchw, params):
    """Full forward pass. x_nchw: [B, C, H, W] float32 -> [B, num_classes]."""
    conv_w = params['conv_w']            # [3, 3, C, Cmid]  (HWIO)
    bn_scale = params['bn_scale']        # [Cmid]
    bn_shift = params['bn_shift']        # [Cmid]
    fc_w = params['fc_w']                # [Cmid, N]
    fc_b = params['fc_b']                # [N]

    B, C, H, W = x_nchw.shape
    c_mid = conv_w.shape[-1]
    n_cls = fc_w.shape[-1]

    cp = _round_up(C, 8)                 # input channels (lane dim of x)
    cmid_p = _round_up(c_mid, 128)       # lane-dense mid channels
    n_p = _round_up(n_cls, 128)          # lane-dense logits (unmasked stores)

    # --- glue: NCHW -> NHWC, halo pad (3x3/s1/p1), channel pad, bf16 cast ---
    # Single padded copy of the input; no overlapping-window materialization.
    x = jnp.transpose(x_nchw, (0, 2, 3, 1))                       # [B,H,W,C]
    x = jnp.pad(x, ((0, 0), (1, 1), (1, 1), (0, cp - C)))
    x = x.astype(jnp.bfloat16)                                    # [B,H+2,W+2,Cp]

    # Fold BN scale into the conv weights, pad channels, merge the 3x3 taps
    # into the contraction dim: [3,3,Cp,Cmid_p] -> [9*Cp, Cmid_p].
    w = conv_w * bn_scale.reshape(1, 1, 1, c_mid)
    w = jnp.pad(w, ((0, 0), (0, 0), (0, cp - C), (0, cmid_p - c_mid)))
    w9 = w.reshape(9 * cp, cmid_p).astype(jnp.bfloat16)

    shift = jnp.pad(bn_shift, (0, cmid_p - c_mid)).reshape(1, cmid_p)
    shift = shift.astype(jnp.float32)
    fcw = jnp.pad(fc_w, ((0, cmid_p - c_mid), (0, n_p - n_cls)))
    fcw = fcw.astype(jnp.bfloat16)
    fcb = jnp.pad(fc_b, (0, n_p - n_cls)).reshape(1, n_p).astype(jnp.float32)

    # In-kernel row chunking: largest divisor of H with <= 256 pixels/chunk.
    chunk_h = 1
    for cand in range(H, 0, -1):
        if H % cand == 0 and cand * W <= 256:
            chunk_h = cand
            break
    n_chunks = H // chunk_h
    inv_p = 1.0 / float(H * W)

    kernel = functools.partial(fused_stem_kernel, chunk_h=chunk_h,
                               n_chunks=n_chunks, out_w=W, cp=cp, inv_p=inv_p)

    flops = 2 * B * H * W * (9 * cp) * cmid_p + 2 * B * cmid_p * n_p
    bytes_accessed = int(x.size * 2 + w9.size * 2 + fcw.size * 2 +
                         shift.size * 4 + fcb.size * 4 + B * n_p * 4)

    out = pl.pallas_call(
        kernel,
        out_shape=jax.ShapeDtypeStruct((B, 1, n_p), jnp.float32),
        grid_spec=pltpu.PrefetchScalarGridSpec(
            num_scalar_prefetch=0,
            grid=(B,),
            in_specs=[
                # whole halo-padded image for this batch element
                pl.BlockSpec((1, H + 2, W + 2, cp), lambda b: (b, 0, 0, 0)),
                # VMEM-resident parameters (constant index maps)
                pl.BlockSpec((9 * cp, cmid_p), lambda b: (0, 0)),
                pl.BlockSpec((1, cmid_p), lambda b: (0, 0)),
                pl.BlockSpec((cmid_p, n_p), lambda b: (0, 0)),
                pl.BlockSpec((1, n_p), lambda b: (0, 0)),
            ],
            out_specs=pl.BlockSpec((1, 1, n_p), lambda b: (b, 0, 0)),
        ),
        compiler_params=pltpu.CompilerParams(
            dimension_semantics=("parallel",),
            vmem_limit_bytes=32 * 1024 * 1024),
        cost_estimate=pl.CostEstimate(flops=flops, transcendentals=0,
                                      bytes_accessed=bytes_accessed),
    )(x, w9, shift, fcw, fcb)

    return out[:, 0, :n_cls]


# ------------------------------ reference ---------------------------------- #
def reference_forward(x_nchw, params):
    """Pure-JAX f32 reference with identical math (correctness check)."""
    conv_w, bn_scale, bn_shift, fc_w, fc_b = (
        params['conv_w'], params['bn_scale'], params['bn_shift'],
        params['fc_w'], params['fc_b'])
    x = jnp.transpose(x_nchw, (0, 2, 3, 1))                       # NHWC
    y = jax.lax.conv_general_dilated(
        x, conv_w, window_strides=(1, 1), padding='SAME',
        dimension_numbers=('NHWC', 'HWIO', 'NHWC'))
    y = y * bn_scale.reshape(1, 1, 1, -1) + bn_shift.reshape(1, 1, 1, -1)
    y = jnp.maximum(y, 0.0)
    pooled = jnp.mean(y, axis=(1, 2))
    return pooled @ fc_w + fc_b


def init_params(key, c_in, c_mid, n_classes, eps=1e-5):
    """Deterministic synthetic parameters (matches the module's shapes)."""
    k = jax.random.split(key, 6)
    conv_w = jax.random.normal(k[0], (3, 3, c_in, c_mid), jnp.float32) * 0.1
    gamma = 1.0 + 0.1 * jax.random.normal(k[1], (c_mid,), jnp.float32)
    beta = 0.1 * jax.random.normal(k[2], (c_mid,), jnp.float32)
    run_mean = 0.05 * jax.random.normal(k[3], (c_mid,), jnp.float32)
    run_var = jnp.abs(1.0 + 0.1 * jax.random.normal(k[4], (c_mid,), jnp.float32))
    scale = gamma / jnp.sqrt(run_var + eps)
    shift = beta - run_mean * scale
    fc_w = jax.random.normal(k[5], (c_mid, n_classes), jnp.float32) * 0.1
    fc_b = jnp.zeros((n_classes,), jnp.float32)
    return dict(conv_w=conv_w, bn_scale=scale, bn_shift=shift,
                fc_w=fc_w, fc_b=fc_b)


if __name__ == "__main__":
    B, C, H, W = 2, 4, 16, 16
    C_MID, N_CLASSES = 32, 10

    key = jax.random.PRNGKey(0)
    k_x, k_p = jax.random.split(key)
    x = jax.random.normal(k_x, (B, C, H, W), jnp.float32)
    params = init_params(k_p, C, C_MID, N_CLASSES)

    out = model_forward(x, params)
    out = jax.block_until_ready(out)

    ref = reference_forward(x, params)
    assert out.shape == (B, N_CLASSES)
    # bf16 matmul operands with f32 accumulation -> loosened tolerance.
    assert jnp.allclose(out, ref, atol=2e-2, rtol=2e-2), "mismatch vs reference"

    print("KERNEL_OK")
</pallas_src>

<mosaic_0001>
module attributes {stable_mosaic.version = 11 : i64} {
  func.func @fused_stem_kernel(%arg0: i32, %arg1: memref<1x18x18x8xbf16, #tpu.memory_space<vmem>>, %arg2: memref<72x128xbf16, #tpu.memory_space<vmem>>, %arg3: memref<1x128xf32, #tpu.memory_space<vmem>>, %arg4: memref<128x128xbf16, #tpu.memory_space<vmem>>, %arg5: memref<1x128xf32, #tpu.memory_space<vmem>>, %arg6: memref<1x1x128xf32, #tpu.memory_space<vmem>>) attributes {dimension_semantics = [#tpu.dimension_semantics<parallel>], iteration_bounds = array<i64: 2>, scalar_prefetch = 0 : i64, scratch_operands = 0 : i64, tpu.core_type = #tpu.core_type<tc>, window_params = [{transform_indices = @transform_0, window_bounds = array<i64: 1, 18, 18, 8>}, {pipeline_mode = #tpu.pipeline_mode<synchronous>, transform_indices = @transform_1, window_bounds = array<i64: 72, 128>}, {pipeline_mode = #tpu.pipeline_mode<synchronous>, transform_indices = @transform_2, window_bounds = array<i64: 1, 128>}, {pipeline_mode = #tpu.pipeline_mode<synchronous>, transform_indices = @transform_3, window_bounds = array<i64: 128, 128>}, {pipeline_mode = #tpu.pipeline_mode<synchronous>, transform_indices = @transform_4, window_bounds = array<i64: 1, 128>}, {transform_indices = @transform_5, window_bounds = array<i64: 1, 1, 128>}]} {
    %c0 = arith.constant 0 : index
    %c0_0 = arith.constant 0 : index
    %0 = vector.load %arg2[%c0, %c0_0] : memref<72x128xbf16, #tpu.memory_space<vmem>>, vector<72x128xbf16>
    %c0_1 = arith.constant 0 : index
    %c0_2 = arith.constant 0 : index
    %1 = vector.load %arg3[%c0_1, %c0_2] : memref<1x128xf32, #tpu.memory_space<vmem>>, vector<1x128xf32>
    %cst = arith.constant 0.000000e+00 : f32
    %2 = vector.broadcast %cst : f32 to vector<1x128xf32>
    %c0_3 = arith.constant 0 : index
    %c0_4 = arith.constant 0 : index
    %c0_5 = arith.constant 0 : index
    %c0_6 = arith.constant 0 : index
    %3 = vector.load %arg1[%c0_3, %c0_4, %c0_5, %c0_6] : memref<1x18x18x8xbf16, #tpu.memory_space<vmem>>, vector<1x16x16x8xbf16>
    %4 = vector.shape_cast %3 : vector<1x16x16x8xbf16> to vector<16x16x8xbf16>
    %c0_7 = arith.constant 0 : index
    %c0_8 = arith.constant 0 : index
    %c1 = arith.constant 1 : index
    %c0_9 = arith.constant 0 : index
    %5 = vector.load %arg1[%c0_7, %c0_8, %c1, %c0_9] : memref<1x18x18x8xbf16, #tpu.memory_space<vmem>>, vector<1x16x16x8xbf16>
    %6 = vector.shape_cast %5 : vector<1x16x16x8xbf16> to vector<16x16x8xbf16>
    %c0_10 = arith.constant 0 : index
    %c0_11 = arith.constant 0 : index
    %c2 = arith.constant 2 : index
    %c0_12 = arith.constant 0 : index
    %7 = vector.load %arg1[%c0_10, %c0_11, %c2, %c0_12] : memref<1x18x18x8xbf16, #tpu.memory_space<vmem>>, vector<1x16x16x8xbf16>
    %8 = vector.shape_cast %7 : vector<1x16x16x8xbf16> to vector<16x16x8xbf16>
    %c0_13 = arith.constant 0 : index
    %c1_14 = arith.constant 1 : index
    %c0_15 = arith.constant 0 : index
    %c0_16 = arith.constant 0 : index
    %9 = vector.load %arg1[%c0_13, %c1_14, %c0_15, %c0_16] : memref<1x18x18x8xbf16, #tpu.memory_space<vmem>>, vector<1x16x16x8xbf16>
    %10 = vector.shape_cast %9 : vector<1x16x16x8xbf16> to vector<16x16x8xbf16>
    %c0_17 = arith.constant 0 : index
    %c1_18 = arith.constant 1 : index
    %c1_19 = arith.constant 1 : index
    %c0_20 = arith.constant 0 : index
    %11 = vector.load %arg1[%c0_17, %c1_18, %c1_19, %c0_20] : memref<1x18x18x8xbf16, #tpu.memory_space<vmem>>, vector<1x16x16x8xbf16>
    %12 = vector.shape_cast %11 : vector<1x16x16x8xbf16> to vector<16x16x8xbf16>
    %c0_21 = arith.constant 0 : index
    %c1_22 = arith.constant 1 : index
    %c2_23 = arith.constant 2 : index
    %c0_24 = arith.constant 0 : index
    %13 = vector.load %arg1[%c0_21, %c1_22, %c2_23, %c0_24] : memref<1x18x18x8xbf16, #tpu.memory_space<vmem>>, vector<1x16x16x8xbf16>
    %14 = vector.shape_cast %13 : vector<1x16x16x8xbf16> to vector<16x16x8xbf16>
    %c0_25 = arith.constant 0 : index
    %c2_26 = arith.constant 2 : index
    %c0_27 = arith.constant 0 : index
    %c0_28 = arith.constant 0 : index
    %15 = vector.load %arg1[%c0_25, %c2_26, %c0_27, %c0_28] : memref<1x18x18x8xbf16, #tpu.memory_space<vmem>>, vector<1x16x16x8xbf16>
    %16 = vector.shape_cast %15 : vector<1x16x16x8xbf16> to vector<16x16x8xbf16>
    %c0_29 = arith.constant 0 : index
    %c2_30 = arith.constant 2 : index
    %c1_31 = arith.constant 1 : index
    %c0_32 = arith.constant 0 : index
    %17 = vector.load %arg1[%c0_29, %c2_30, %c1_31, %c0_32] : memref<1x18x18x8xbf16, #tpu.memory_space<vmem>>, vector<1x16x16x8xbf16>
    %18 = vector.shape_cast %17 : vector<1x16x16x8xbf16> to vector<16x16x8xbf16>
    %c0_33 = arith.constant 0 : index
    %c2_34 = arith.constant 2 : index
    %c2_35 = arith.constant 2 : index
    %c0_36 = arith.constant 0 : index
    %19 = vector.load %arg1[%c0_33, %c2_34, %c2_35, %c0_36] : memref<1x18x18x8xbf16, #tpu.memory_space<vmem>>, vector<1x16x16x8xbf16>
    %20 = vector.shape_cast %19 : vector<1x16x16x8xbf16> to vector<16x16x8xbf16>
    %21 = tpu.concatenate %4, %6, %8, %10, %12, %14, %16, %18, %20 in 2 : vector<16x16x8xbf16>, vector<16x16x8xbf16>, vector<16x16x8xbf16>, vector<16x16x8xbf16>, vector<16x16x8xbf16>, vector<16x16x8xbf16>, vector<16x16x8xbf16>, vector<16x16x8xbf16>, vector<16x16x8xbf16> -> vector<16x16x72xbf16>
    %22 = vector.shape_cast %21 : vector<16x16x72xbf16> to vector<256x72xbf16>
    %cst_37 = arith.constant dense<0.000000e+00> : vector<256x128xf32>
    %23 = tpu.matmul %22, %0, %cst_37 {dimension_numbers = #tpu.dot_dimension_numbers<[1], [0], [0], [1], [0, 0, 1, 1], [], []>} : vector<256x72xbf16>, vector<72x128xbf16>, vector<256x128xf32> -> vector<256x128xf32>
    %24 = vector.broadcast %1 : vector<1x128xf32> to vector<256x128xf32>
    %25 = arith.addf %23, %24 : vector<256x128xf32>
    %cst_38 = arith.constant 0.000000e+00 : f32
    %26 = vector.broadcast %cst_38 : f32 to vector<256x128xf32>
    %27 = arith.maximumf %25, %26 : vector<256x128xf32>
    %cst_39 = arith.constant dense<0.000000e+00> : vector<128xf32>
    %28 = vector.multi_reduction <add>, %27, %cst_39 [0] : vector<256x128xf32> to vector<128xf32>
    %29 = vector.shape_cast %28 : vector<128xf32> to vector<1x128xf32>
    %30 = arith.addf %2, %29 : vector<1x128xf32>
    %cst_40 = arith.constant 3.906250e-03 : f32
    %31 = vector.broadcast %cst_40 : f32 to vector<1x128xf32>
    %32 = arith.mulf %30, %31 : vector<1x128xf32>
    %33 = arith.truncf %32 : vector<1x128xf32> to vector<1x128xbf16>
    %c0_41 = arith.constant 0 : index
    %c0_42 = arith.constant 0 : index
    %34 = vector.load %arg4[%c0_41, %c0_42] : memref<128x128xbf16, #tpu.memory_space<vmem>>, vector<128x128xbf16>
    %cst_43 = arith.constant dense<0.000000e+00> : vector<1x128xf32>
    %35 = tpu.matmul %33, %34, %cst_43 {dimension_numbers = #tpu.dot_dimension_numbers<[1], [0], [0], [1], [0, 0, 1, 1], [], []>} : vector<1x128xbf16>, vector<128x128xbf16>, vector<1x128xf32> -> vector<1x128xf32>
    %c0_44 = arith.constant 0 : index
    %c0_45 = arith.constant 0 : index
    %36 = vector.load %arg5[%c0_44, %c0_45] : memref<1x128xf32, #tpu.memory_space<vmem>>, vector<1x128xf32>
    %37 = arith.addf %35, %36 : vector<1x128xf32>
    %c0_46 = arith.constant 0 : index
    %c0_47 = arith.constant 0 : index
    %c0_48 = arith.constant 0 : index
    %38 = vector.load %arg6[%c0_46, %c0_47, %c0_48] : memref<1x1x128xf32, #tpu.memory_space<vmem>>, vector<1x1x128xf32>
    %39 = vector.shape_cast %38 : vector<1x1x128xf32> to vector<1x128xf32>
    %40 = vector.shape_cast %37 : vector<1x128xf32> to vector<1x1x128xf32>
    tpu.vector_store %arg6[%c0_46, %c0_47, %c0_48], %40 {strides = array<i32>} : memref<1x1x128xf32, #tpu.memory_space<vmem>>, vector<1x1x128xf32>,
    return
  }
  func.func @transform_0(%arg0: i32) -> (i32, i32, i32, i32) {
    %c0_i32 = arith.constant 0 : i32
    %c0_i32_0 = arith.constant 0 : i32
    %c0_i32_1 = arith.constant 0 : i32
    %c0_i32_2 = arith.constant 0 : i32
    return %arg0, %c0_i32, %c0_i32_0, %c0_i32_1 : i32, i32, i32, i32
  }
  func.func @transform_1(%arg0: i32) -> (i32, i32) {
    %c0_i32 = arith.constant 0 : i32
    %c0_i32_0 = arith.constant 0 : i32
    %c0_i32_1 = arith.constant 0 : i32
    return %c0_i32, %c0_i32_0 : i32, i32
  }
  func.func @transform_2(%arg0: i32) -> (i32, i32) {
    %c0_i32 = arith.constant 0 : i32
    %c0_i32_0 = arith.constant 0 : i32
    %c0_i32_1 = arith.constant 0 : i32
    return %c0_i32, %c0_i32_0 : i32, i32
  }
  func.func @transform_3(%arg0: i32) -> (i32, i32) {
    %c0_i32 = arith.constant 0 : i32
    %c0_i32_0 = arith.constant 0 : i32
    %c0_i32_1 = arith.constant 0 : i32
    return %c0_i32, %c0_i32_0 : i32, i32
  }
  func.func @transform_4(%arg0: i32) -> (i32, i32) {
    %c0_i32 = arith.constant 0 : i32
    %c0_i32_0 = arith.constant 0 : i32
    %c0_i32_1 = arith.constant 0 : i32
    return %c0_i32, %c0_i32_0 : i32, i32
  }
  func.func @transform_5(%arg0: i32) -> (i32, i32, i32) {
    %c0_i32 = arith.constant 0 : i32
    %c0_i32_0 = arith.constant 0 : i32
    %c0_i32_1 = arith.constant 0 : i32
    return %arg0, %c0_i32, %c0_i32_0 : i32, i32, i32
  }
}

</mosaic_0001>

<bundles_post_ra>
// kernel: tpu_custom_call.1
= control target key start
LH: loop header
LB: loop body
LE: loop exit
PB: predicated region body
PF: predicated region fallthrough
CT: control target
= control target key end

     0   :  { %10 = vsyncpa [#allocation3], 0  ;;  %s4621_s0 = inlined_call_operand.vmem [shape: bf16[2,18,18,8], index: 0, kind: input, shape index: {}]   ;;  %s4622_s1 = inlined_call_operand.vmem [shape: bf16[72,128], index: 1, kind: input, shape index: {}]   ;;  %s4623_s2 = inlined_call_operand.vmem [shape: f32[1,128], index: 2, kind: input, shape index: {}]   ;;  %s4624_s3 = inlined_call_operand.vmem [shape: bf16[128,128], index: 3, kind: input, shape index: {}]   ;;  %s4625_s4 = inlined_call_operand.vmem [shape: f32[1,128], index: 4, kind: input, shape index: {}]   ;;  %s4626_s5 = inlined_call_operand.hbm [shape: f32[2,1,128], index: 5, kind: output, shape index: {}]  }
   0x1   :  { %12 = vsyncpa [#allocation3 + $0x1], 0  ;;  %s3389_s18 = smov 0   ;;  %s3391_s19 = smov 0  }
   0x2   :  { %s3393_s20 = smov 0   ;;  %s3395_s21 = smov 0  }
   0x3 LB: > { %s3410_s22 = sadd.s32 4294967295, %s3346_s21   ;;  %s2674_s23 = sadd.s32 4294967294, %s3346_s21   ;;  %s3346_s21 = sphi %s3395_s21, %s4632_s21   ;;  %s3342_s20 = sphi %s3393_s20, %s4631_s20   ;;  %s3338_s19 = sphi %s3391_s19, %s4630_s19   ;;  %s3334_s18 = sphi %s3389_s18, %s4629_s18  }
   0x4   : > { %s3414_s24 = sadd.s32 1, %s3346_s21   ;;  %s135_s25 = sadd.s32 1, %s3342_s20 }
   0x5   : > { %s132_s26 = ssub.s32 %s3346_s21, %s3414_s24  ;;  %p145_p0 = scmp.ne.s32.totalorder %s3342_s20, %s3338_s19 }
   0x6   : > { %p133_p1 = scmp.eq.s32.totalorder %s132_s26, 0  ;;  %p146_p2 = scmp.eq.s32.totalorder %s3410_s22, 1 }
   0x7   : > { %p151_p3 = scmp.ne.s32.totalorder %s3338_s19, %s3334_s18  ;;  %p152_p4 = scmp.eq.s32.totalorder %s2674_s23, 1 }
   0x8   : > { %s3425_s27 = scalar_select %p133_p1, %s3342_s20, %s135_s25  }
   0x9   : > { %p3427_p5 = por %p146_p2, %p145_p0  ;;  %p3431_p6 = por %p152_p4, %p151_p3 }
   0xa   : > { %p2677_p7 = scmp.ge.s32.totalorder %s3346_s21, 1  ;;  %p190_p8 = scmp.lt.s32.totalorder %s3346_s21, 3 }
   0xc   : > { %p191_p9 = pnand %p2677_p7, %p190_p8 }
   0xd   : > { %p217_p10 = scmp.lt.s32.totalorder (!%p191_p9), %s3410_s22, 1  ;;  %vm828_vm0 = vcmask (!%p191_p9), 1046528   ;;  %s3348_s10 = smov (!%p191_p9), 24   ;;  %vm555_vm1 = vsmask.f32 (!%p191_p9), 7424  ;;  %v3201_v31 = vld [vmem:[%s4622_s1] sm:$0xff] (!%p191_p9)  }
   0xe   : > { %194 = sbr.rel (%p191_p9) target bundleno = 871 (0x367), region = 40  ;;  %s3349_s13 = smov (!%p191_p9), 40   ;;  %3014 = vmatprep.subr.bf16.mxu0 (!%p191_p9), %v3201_v31  ;;  %v3204_v58 = vld [vmem:[%s4622_s1 + $0x8] sm:$0xff] (!%p191_p9)   ;;  %v3207_v63 = vld [vmem:[%s4622_s1 + $0x10] sm:$0xff] (!%p191_p9)   ;;  %vm2263_vm2 = vcmask (!%p191_p9), 1043456   ;;  %vm1933_vm3 = vcmask (!%p191_p9), 64512  }
   0xf   : > { %s3350_s14 = smov (!%p191_p9), 16   ;;  %3015 = vmatpush3.bf16.msra.mxu0 (!%p191_p9), %v3201_v31  ;;  %s3351_s25 = smov (!%p191_p9), 8   ;;  %vm1966_vm4 = vcmask (!%p191_p9), 130048   ;;  %vm1999_vm5 = vcmask (!%p191_p9), 195584   ;;  %vm2032_vm6 = vcmask (!%p191_p9), 261120   ;;  %vm2065_vm7 = vcmask (!%p191_p9), 326656  }
  0x10   : > { %3016 = vmatprep.subr.bf16.mxu0 (!%p191_p9), %v3204_v58  ;;  %s3353_s7 = smov (!%p191_p9), 48   ;;  %s3354_s8 = smov (!%p191_p9), 56   ;;  %vm2098_vm8 = vcmask (!%p191_p9), 392192   ;;  %vm2131_vm9 = vcmask (!%p191_p9), 457728   ;;  %vm2164_vm10 = vcmask (!%p191_p9), 523264   ;;  %vm2230_vm11 = vcmask (!%p191_p9), 588800  }
  0x11   : > { %s3355_s11 = smov (!%p191_p9), 64   ;;  %vm3357_vm12 = vmmov (!%p191_p9), 0   ;;  %s2981_s17 = sshll.u32 (!%p191_p9), %s3410_s22, 4 }
  0x13   : > { %3017 = vmatpush3.bf16.msra.mxu0 (!%p191_p9), %v3204_v58 }
  0x14   : > { %3018 = vmatprep.subr.bf16.mxu0 (!%p191_p9), %v3207_v63 }
  0x15   : > { %s218_s30 = scalar_select %p217_p10, %s3410_s22, 1 }
  0x17   : > { %s3077_s6 = smul.u32 216, %s218_s30  ;;  %3019 = vmatpush3.bf16.msra.mxu0 %v3207_v63 }
  0x19   : > { %s3442_s9 = scalar_lea.vmem %s4621_s0, %s3077_s6  ;;  %s3352_s6 = smov 32  }
  0x1a   : > { %v2681_v0 = vld [vmem:[%s3442_s9 + $0x18] sm:$0xf]  ;;  %v2682_v1 = vld [vmem:[%s3442_s9 + $0x1c] sm:$0xf]  ;;  %v2679_v5 = vld [vmem:[%s3442_s9 + $0xc] sm:$0xf] }
  0x1b   : > { %v2728_v2 = vld [vmem:[%s3442_s9 + $0x18] sm:$0xe]  ;;  %v3447_v3 = vcombine.low %v2681_v0, %v2682_v1  ;;  %v2680_v6 = vld [vmem:[%s3442_s9 + $0x10] sm:$0xf]  ;;  %v2727_v7 = vld [vmem:[%s3442_s9 + $0xc] sm:$0xe] }
  0x1c   : > { %v2888_v4 = vcombine.low %v2728_v2, %v2682_v1  ;;  %v3452_v8 = vcombine.low %v2679_v5, %v2680_v6  ;;  %v2887_v9 = vcombine.low %v2727_v7, %v2680_v6  ;;  %v3455_v10 = vld [vmem:[%s3442_s9 + $0x14] ss:$0 sps:$4 sm:$0x11]   ;;  %v234_v12 = vld [vmem:[%s3442_s9 + $0x4] sm:$0xf] }
  0x1d   : > { %991 = vrot.lane.b32.xlu1 %v3447_v3, %s3348_s10  ;;  %v1084_v11 = vshll.u32 %v3447_v3, 16  ;;  %v1342_v15 = vrot.slane %v3455_v10, 1  ;;  %v281_v16 = vld [vmem:[%s3442_s9] sm:$0xe]  ;;  %v1082_v21 = vshrl.u32 %v3447_v3, 16  ;;  %v1077_v61 = vshll.u32 %v3455_v10, 16 }
  0x1e   : > { %989 = vrot.lane.b32.xlu0 %v3452_v8, %s3348_s10  ;;  %v1072_v13 = vshll.u32 %v3452_v8, 16  ;;  %v1341_v14 = vrot.slane %v2887_v9, 1  ;;  %v1344_v17 = vrot.slane %v2888_v4, 1  ;;  %v3132_v18 = vld [vmem:[%s3442_s9 + $0x8] ss:$0 sps:$4 sm:$0x11]   ;;  %v2839_v19 = vcombine.low %v281_v16, %v234_v12 }
  0x1f   : > { %v233_v20 = vld [vmem:[%s3442_s9] sm:$0xf]  ;;  %v235_v24 = vld [vmem:[%s3442_s9 + $0xc] sm:$0xf]  ;;  %v236_v25 = vld [vmem:[%s3442_s9 + $0x10] sm:$0xf] }
  0x20   : > { %v1343_v22 = vsel %vm828_vm0, %v1341_v14, %v1342_v15  ;;  %v3470_v23 = vcombine.low %v233_v20, %v234_v12  ;;  %v829_v26 = vrot.slane %v2839_v19, 1  ;;  %v830_v27 = vrot.slane %v3132_v18, 1  ;;  %v282_v28 = vld [vmem:[%s3442_s9 + $0xc] sm:$0xe]  ;;  %v2745_v44 = vld [vmem:[%s3442_s9 + $0x24] sm:$0xf] }
  0x21   : > { %v3475_v29 = vcombine.low %v235_v24, %v236_v25  ;;  %v564_v30 = vshll.u32 %v3132_v18, 16  ;;  %v3136_v32 = vld [vmem:[%s3442_s9 + $0x14] ss:$0 sps:$4 sm:$0x11]   ;;  %v2840_v33 = vcombine.low %v282_v28, %v236_v25  ;;  %v1086_v36 = vrot.slane %v1084_v11, 1 }
  0x22   : > { %1389 = vrot.lane.b32.xlu0 %v1343_v22, %s3349_s13  ;;  %v557_v34 = vshrl.u32 %v3470_v23, 16  ;;  %v559_v35 = vshll.u32 %v3470_v23, 16  ;;  %v831_v37 = vsel %vm828_vm0, %v829_v26, %v830_v27  ;;  %v3138_v39 = vld [vmem:[%s3442_s9 + $0x20] ss:$0 sps:$4 sm:$0x11]   ;;  %v833_v41 = vrot.slane %v3136_v32, 1 }
  0x23   : > { %v566_v38 = vrot.slane %v564_v30, 1  ;;  %877 = vrot.lane.b32.xlu1 %v831_v37, %s3350_s14  ;;  %v832_v40 = vrot.slane %v2840_v33, 1  ;;  %v569_v43 = vshrl.u32 %v3475_v29, 16  ;;  %v1345_v45 = vrot.slane %v3138_v39, 1  ;;  %v3491_v49 = vld [vmem:[%s3442_s9 + $0x28] sm:$0xf] }
  0x24   : > { %v561_v42 = vrot.slane %v559_v35, 1  ;;  %v571_v46 = vshll.u32 %v3475_v29, 16  ;;  %v576_v47 = vshll.u32 %v3136_v32, 16  ;;  %v1089_v48 = vshll.u32 %v3138_v39, 16  ;;  %v2743_v54 = vld [vmem:[%s3442_s9 + $0x18] sm:$0xf] }
  0x25   : > { %v834_v50 = vsel %vm828_vm0, %v832_v40, %v833_v41  ;;  %v1070_v52 = vshrl.u32 %v3452_v8, 16  ;;  %v1074_v53 = vrot.slane %v1072_v13, 1  ;;  %v3497_v57 = vld [vmem:[%s3442_s9 + $0x1c] sm:$0xf]  ;;  %v1087_v60 = vor.u32 %v1086_v36, %v1082_v21  ;;  %v2791_v8 = vld [vmem:[%s3442_s9 + $0x18] sm:$0xe] }
  0x26   : > { %v562_v51 = vor.u32 %v561_v42, %v557_v34  ;;  %v573_v55 = vrot.slane %v571_v46, 1  ;;  %v578_v56 = vrot.slane %v576_v47, 1  ;;  %v2904_v62 = vcombine.low %v2745_v44, %v3491_v49  ;;  %v3513_v4 = vld [vmem:[%s3442_s9 + $0x2c] ss:$0 sps:$4 sm:$0x11]  }
  0x27   : > { %879 = vrot.lane.b32.xlu1 %v834_v50, %s3350_s14  ;;  %v1346_v0 = vsel %vm828_vm0, %v1344_v17, %v1345_v45  ;;  %v1091_v2 = vrot.slane %v1089_v48, 1  ;;  %v2903_v3 = vcombine.low %v2743_v54, %v3497_v57  ;;  %v1075_v5 = vor.u32 %v1074_v53, %v1070_v52  ;;  %v3517_v9 = vld [vmem:[%s3442_s9 + $0x20] ss:$0 sps:$4 sm:$0x11]   ;;  %v237_v14 = vld [vmem:[%s3442_s9 + $0x18] sm:$0xf] }
  0x28   : > { %v567_v59 = vsel %vm555_vm1, %v562_v51, %v566_v38  ;;  %v574_v1 = vor.u32 %v573_v55, %v569_v43  ;;  %v1079_v6 = vrot.slane %v1077_v61, 1  ;;  %v1596_v7 = vshll.u32 %v2904_v62, 16  ;;  %v3524_v16 = vld [vmem:[%s3442_s9 + $0x1c] sm:$0xf]  ;;  %v239_v26 = vld [vmem:[%s3442_s9 + $0x24] sm:$0xf] }
  0x29   : > { %748 = vrot.lane.b32.xlu0 %v567_v59, %s3351_s25  ;;  %v1584_v11 = vshll.u32 %v2903_v3, 16  ;;  %v1594_v12 = vshrl.u32 %v2904_v62, 16  ;;  %v1601_v13 = vshll.u32 %v3513_v4, 16  ;;  %v3212_v17 = vld [vmem:[%s4622_s1 + $0x18] sm:$0xff]   ;;  %v1092_v18 = vsel %vm555_vm1, %v1087_v60, %v1091_v2  ;;  %v240_v27 = vld [vmem:[%s3442_s9 + $0x28] sm:$0xf] }
  0x2a   : > { %v579_v10 = vsel %vm555_vm1, %v574_v1, %v578_v56  ;;  %v1598_v15 = vrot.slane %v1596_v7, 1  ;;  %v1582_v19 = vshrl.u32 %v2903_v3, 16  ;;  %v3532_v20 = vcombine.low %v237_v14, %v3524_v16  ;;  %v3535_v21 = vld [vmem:[%s3442_s9 + $0x20] ss:$0 sps:$4 sm:$0x11]   ;;  %3020 = vmatprep.subr.bf16.mxu0 %v3212_v17 }
  0x2b   : > { %1391 = vrot.lane.b32.xlu1 %v1346_v0, %s3349_s13  ;;  %v1080_v22 = vsel %vm555_vm1, %v1075_v5, %v1079_v6  ;;  %v1586_v24 = vrot.slane %v1584_v11, 1  ;;  %v1589_v25 = vshll.u32 %v3517_v9, 16  ;;  %v2935_v28 = vcombine.low %v2791_v8, %v3497_v57  ;;  %v3148_v37 = vld [vmem:[%s3442_s9 + $0x2c] ss:$0 sps:$4 sm:$0x11]   ;;  %3021 = vmatpush3.bf16.msra.mxu0 %v3212_v17 }
  0x2c   : > { %v583_v30 = vshll.u32 %v3532_v20, 16  ;;  %v1599_v31 = vor.u32 %v1598_v15, %v1594_v12  ;;  %v1603_v32 = vrot.slane %v1601_v13, 1  ;;  %v588_v33 = vshll.u32 %v3535_v21, 16  ;;  %v2792_v41 = vld [vmem:[%s3442_s9 + $0x24] sm:$0xe] }
  0x2d   : > { %750 = vrot.lane.b32.xlu0 %v579_v10, %s3351_s25  ;;  %v3545_v34 = vcombine.low %v239_v26, %v240_v27  ;;  %v581_v35 = vshrl.u32 %v3532_v20, 16  ;;  %v1587_v38 = vor.u32 %v1586_v24, %v1582_v19  ;;  %v1591_v39 = vrot.slane %v1589_v25, 1  ;;  %v284_v46 = vld [vmem:[%s3442_s9 + $0x24] sm:$0xe]  ;;  %v283_v52 = vld [vmem:[%s3442_s9 + $0x18] sm:$0xe] }
  0x2e   : > { %v585_v36 = vrot.slane %v583_v30, 1  ;;  %v1604_v42 = vsel %vm555_vm1, %v1599_v31, %v1603_v32  ;;  %v590_v43 = vrot.slane %v588_v33, 1  ;;  %v1853_v44 = vrot.slane %v2935_v28, 1  ;;  %v2685_v55 = vld [vmem:[%s3442_s9 + $0x30] sm:$0xf] }
  0x2f   : > { %1263 = vrot.lane.b32.xlu1 %v1092_v18, %s3352_s6  ;;  %v595_v40 = vshll.u32 %v3545_v34, 16  ;;  %v1854_v45 = vrot.slane %v3517_v9, 1  ;;  %v593_v48 = vshrl.u32 %v3545_v34, 16  ;;  %v600_v51 = vshll.u32 %v3148_v37, 16  ;;  %v2686_v56 = vld [vmem:[%s3442_s9 + $0x34] sm:$0xf] }
  0x30   : > { %v586_v47 = vor.u32 %v585_v36, %v581_v35  ;;  %v2936_v53 = vcombine.low %v2792_v41, %v3491_v49  ;;  %v1592_v54 = vsel %vm555_vm1, %v1587_v38, %v1591_v39  ;;  %v2683_v57 = vld [vmem:[%s3442_s9 + $0x24] sm:$0xf]  ;;  %v2684_v58 = vld [vmem:[%s3442_s9 + $0x28] sm:$0xf]  ;;  %v2842_v60 = vcombine.low %v284_v46, %v240_v27  ;;  %v2730_v14 = vld [vmem:[%s3442_s9 + $0x30] sm:$0xe] }
  0x31   : > { %1261 = vrot.lane.b32.xlu0 %v1080_v22, %s3352_s6  ;;  %v597_v50 = vrot.slane %v595_v40, 1  ;;  %v1855_v59 = vsel %vm828_vm0, %v1853_v44, %v1854_v45  ;;  %v602_v63 = vrot.slane %v600_v51, 1  ;;  %v2858_v49 = vcombine.low %v2685_v55, %v2686_v56  ;;  %v3573_v5 = vld [vmem:[%s3442_s9 + $0x38] ss:$0 sps:$4 sm:$0x11]  }
  0x32   : > { %v591_v61 = vsel %vm555_vm1, %v586_v47, %v590_v43  ;;  %v1856_v0 = vrot.slane %v2936_v53, 1  ;;  %v1857_v1 = vrot.slane %v3513_v4, 1  ;;  %v2841_v2 = vcombine.low %v283_v52, %v3524_v16  ;;  %v3156_v13 = vld [vmem:[%s3442_s9 + $0x2c] ss:$0 sps:$4 sm:$0x11]  }
  0x33   : > { %1503 = vrot.lane.b32.xlu1 %v2904_v62, %s3353_s7  ;;  %v598_v62 = vor.u32 %v597_v50, %v593_v48  ;;  %v838_v7 = vrot.slane %v2842_v60, 1  ;;  %v839_v8 = vrot.slane %v3148_v37, 1  ;;  %v1108_v9 = vshll.u32 %v2858_v49, 16  ;;  %v2729_v15 = vld [vmem:[%s3442_s9 + $0x24] sm:$0xe] }
  0x34   : > { %v1858_v4 = vsel %vm828_vm0, %v1856_v0, %v1857_v1  ;;  %v835_v10 = vrot.slane %v2841_v2, 1  ;;  %v836_v11 = vrot.slane %v3535_v21, 1  ;;  %v1106_v16 = vshrl.u32 %v2858_v49, 16  ;;  %v2749_v24 = vld [vmem:[%s3442_s9 + $0x3c] sm:$0xf] }
  0x35   : > { %1501 = vrot.lane.b32.xlu0 %v2903_v3, %s3353_s7  ;;  %v2857_v3 = vcombine.low %v2683_v57, %v2684_v58  ;;  %v603_v6 = vsel %vm555_vm1, %v598_v62, %v602_v63  ;;  %v1113_v17 = vshll.u32 %v3573_v5, 16  ;;  %v840_v18 = vsel %vm828_vm0, %v838_v7, %v839_v8  ;;  %v3588_v25 = vld [vmem:[%s3442_s9 + $0x40] sm:$0xf]  ;;  %v2747_v28 = vld [vmem:[%s3442_s9 + $0x30] sm:$0xf] }
  0x36   : > { %v1110_v19 = vrot.slane %v1108_v9, 1  ;;  %v837_v21 = vsel %vm828_vm0, %v835_v10, %v836_v11  ;;  %v1101_v27 = vshll.u32 %v3156_v13, 16  ;;  %v2748_v30 = vld [vmem:[%s3442_s9 + $0x34] sm:$0xf]  ;;  %v2890_v31 = vcombine.low %v2730_v14, %v2686_v56  ;;  %v241_v40 = vld [vmem:[%s3442_s9 + $0x30] sm:$0xf] }
  0x37   : > { %1775 = vrot.lane.b32.xlu1 %v1604_v42, %s3354_s8  ;;  %v1096_v12 = vshll.u32 %v2857_v3, 16  ;;  %v1094_v22 = vshrl.u32 %v2857_v3, 16  ;;  %v2889_v32 = vcombine.low %v2729_v15, %v2684_v58  ;;  %v2906_v33 = vcombine.low %v2749_v24, %v3588_v25  ;;  %v3598_v41 = vld [vmem:[%s3442_s9 + $0x34] sm:$0xf]  ;;  %v244_v55 = vld [vmem:[%s3442_s9 + $0x40] sm:$0xf] }
  0x38   : > { %v1111_v35 = vor.u32 %v1110_v19, %v1106_v16  ;;  %v1115_v36 = vrot.slane %v1113_v17, 1  ;;  %v2905_v37 = vcombine.low %v2747_v28, %v2748_v30  ;;  %v1103_v39 = vrot.slane %v1101_v27, 1  ;;  %v3603_v47 = vld [vmem:[%s3442_s9 + $0x44] ss:$0 sps:$4 sm:$0x11]  }
  0x39   : > { %1773 = vrot.lane.b32.xlu0 %v1592_v54, %s3354_s8  ;;  %v1098_v26 = vrot.slane %v1096_v12, 1  ;;  %v1350_v42 = vrot.slane %v2890_v31, 1  ;;  %v1351_v43 = vrot.slane %v3573_v5, 1  ;;  %v1347_v44 = vrot.slane %v2889_v32, 1  ;;  %v243_v54 = vld [vmem:[%s3442_s9 + $0x3c] sm:$0xf] }
  0x3a   : > { %v1348_v45 = vrot.slane %v3156_v13, 1  ;;  %v1620_v46 = vshll.u32 %v2906_v33, 16  ;;  %v1116_v48 = vsel %vm555_vm1, %v1111_v35, %v1115_v36  ;;  %v1608_v50 = vshll.u32 %v2905_v37, 16  ;;  %v3162_v51 = vld [vmem:[%s3442_s9 + $0x38] ss:$0 sps:$4 sm:$0x11]  }
  0x3b   : > { %752 = vrot.lane.b32.xlu1 %v591_v61, %s3351_s25  ;;  %v1099_v38 = vor.u32 %v1098_v26, %v1094_v22  ;;  %v3609_v52 = vcombine.low %v241_v40, %v3598_v41  ;;  %v1618_v56 = vshrl.u32 %v2906_v33, 16  ;;  %v1625_v58 = vshll.u32 %v3603_v47, 16  ;;  %v2793_v61 = vld [vmem:[%s3442_s9 + $0x30] sm:$0xe]  ;;  %v286_v26 = vld [vmem:[%s3442_s9 + $0x3c] sm:$0xe] }
  0x3c   : > { %v1622_v57 = vrot.slane %v1620_v46, 1  ;;  %v1352_v60 = vsel %vm828_vm0, %v1350_v42, %v1351_v43  ;;  %v3623_v63 = vcombine.low %v243_v54, %v244_v55  ;;  %v1606_v0 = vshrl.u32 %v2905_v37, 16  ;;  %v3166_v10 = vld [vmem:[%s3442_s9 + $0x44] ss:$0 sps:$4 sm:$0x11]  }
  0x3d   : > { %1901 = vrot.lane.b32.xlu0 %v1855_v59, %s3355_s11  ;;  %v1104_v53 = vsel %vm555_vm1, %v1099_v38, %v1103_v39  ;;  %v3617_v59 = vld [vmem:[%s3442_s9 + $0x38] ss:$0 sps:$4 sm:$0x11]   ;;  %v607_v62 = vshll.u32 %v3609_v52, 16  ;;  %v1610_v1 = vrot.slane %v1608_v50, 1  ;;  %v1613_v2 = vshll.u32 %v3162_v51, 16 }
  0x3e   : > { %v2937_v5 = vcombine.low %v2793_v61, %v2748_v30  ;;  %v1627_v7 = vrot.slane %v1625_v58, 1  ;;  %v612_v8 = vshll.u32 %v3617_v59, 16  ;;  %v605_v9 = vshrl.u32 %v3609_v52, 16  ;;  %v2690_v28 = vld [vmem:[%s3442_s9 + $0x4c] sm:$0xf] }
  0x3f   : > { %754 = vrot.lane.b32.xlu1 %v603_v6, %s3351_s25  ;;  %v1623_v6 = vor.u32 %v1622_v57, %v1618_v56  ;;  %v619_v11 = vshll.u32 %v3623_v63, 16  ;;  %v1611_v12 = vor.u32 %v1610_v1, %v1606_v0  ;;  %v1615_v13 = vrot.slane %v1613_v2, 1  ;;  %v285_v30 = vld [vmem:[%s3442_s9 + $0x30] sm:$0xe]  ;;  %v2687_v31 = vld [vmem:[%s3442_s9 + $0x3c] sm:$0xf] }
  0x40   : > { %v614_v16 = vrot.slane %v612_v8, 1  ;;  %v1859_v17 = vrot.slane %v2937_v5, 1  ;;  %v617_v22 = vshrl.u32 %v3623_v63, 16  ;;  %v2688_v32 = vld [vmem:[%s3442_s9 + $0x40] sm:$0xf]  ;;  %v2844_v35 = vcombine.low %v286_v26, %v244_v55 }
  0x41   : > { %1903 = vrot.lane.b32.xlu0 %v1858_v4, %s3355_s11  ;;  %v609_v4 = vrot.slane %v607_v62, 1  ;;  %v1628_v15 = vsel %vm555_vm1, %v1623_v6, %v1627_v7  ;;  %v621_v24 = vrot.slane %v619_v11, 1  ;;  %v1616_v27 = vsel %vm555_vm1, %v1611_v12, %v1615_v13  ;;  %v3174_v55 = vld [vmem:[%s3442_s9 + $0x44] ss:$0 sps:$4 sm:$0x11]  }
  0x42   : > { %v1863_v42 = vrot.slane %v3603_v47, 1  ;;  %v2843_v43 = vcombine.low %v285_v30, %v3598_v41  ;;  %v844_v46 = vrot.slane %v2844_v35, 1  ;;  %v842_v54 = vrot.slane %v3617_v59, 1  ;;  %v2753_v56 = vld [vmem:[%s3442_s9 + $0x54] sm:$0xf] }
  0x43   : > { %883 = vrot.lane.b32.xlu1 %v840_v18, %s3350_s14  ;;  %v1860_v18 = vrot.slane %v3162_v51, 1  ;;  %v610_v19 = vor.u32 %v609_v4, %v605_v9  ;;  %v3173_v51 = vld [vmem:[%s3442_s9 + $0x50] ss:$0 sps:$4 sm:$0x11]   ;;  %v3661_v57 = vld [vmem:[%s3442_s9 + $0x58] sm:$0xf] }
  0x44   : > { %v841_v47 = vrot.slane %v2843_v43, 1  ;;  %v2731_v0 = vld [vmem:[%s3442_s9 + $0x3c] sm:$0xe]  ;;  %v2908_v5 = vcombine.low %v2753_v56, %v3661_v57  ;;  %v2751_v6 = vld [vmem:[%s3442_s9 + $0x48] sm:$0xf] }
  0x45   : > { %881 = vrot.lane.b32.xlu0 %v837_v21, %s3350_s14  ;;  %v624_v21 = vshll.u32 %v3166_v10, 16  ;;  %v615_v36 = vsel %vm555_vm1, %v610_v19, %v614_v16  ;;  %v1861_v40 = vsel %vm828_vm0, %v1859_v17, %v1860_v18  ;;  %v3671_v7 = vld [vmem:[%s3442_s9 + $0x4c] sm:$0xf]  ;;  %v2891_v9 = vcombine.low %v2731_v0, %v2688_v32  ;;  %v245_v11 = vld [vmem:[%s3442_s9 + $0x48] sm:$0xf] }
  0x46   : > { %v843_v59 = vsel %vm828_vm0, %v841_v47, %v842_v54  ;;  %v3677_v12 = vld [vmem:[%s3442_s9 + $0x4c] sm:$0xf]  ;;  %v1644_v16 = vshll.u32 %v2908_v5, 16  ;;  %v1357_v18 = vrot.slane %v3173_v51, 1  ;;  %v247_v30 = vld [vmem:[%s3442_s9 + $0x54] sm:$0xf] }
  0x47   : > { %995 = vrot.lane.b32.xlu1 %v2858_v49, %s3348_s10  ;;  %v1349_v49 = vsel %vm828_vm0, %v1347_v44, %v1348_v45  ;;  %v626_v38 = vrot.slane %v624_v21, 1  ;;  %v2859_v44 = vcombine.low %v2687_v31, %v2688_v32  ;;  %v3682_v19 = vld [vmem:[%s3442_s9 + $0x5c] ss:$0 sps:$4 sm:$0x11]   ;;  %v1353_v21 = vrot.slane %v2891_v9, 1 }
  0x48   : > { %v3690_v26 = vld [vmem:[%s3442_s9 + $0x50] ss:$0 sps:$4 sm:$0x11]   ;;  %v3695_v31 = vld [vmem:[%s3442_s9 + $0x58] sm:$0xf]  ;;  %v1642_v32 = vshrl.u32 %v2908_v5, 16 }
  0x49   : > { %993 = vrot.lane.b32.xlu0 %v2857_v3, %s3348_s10  ;;  %v2794_v3 = vld [vmem:[%s3442_s9 + $0x3c] sm:$0xe]  ;;  %v1120_v41 = vshll.u32 %v2859_v44, 16  ;;  %v1118_v1 = vshrl.u32 %v2859_v44, 16  ;;  %v1649_v35 = vshll.u32 %v3682_v19, 16 }
  0x4a   : > { %v2938_v14 = vcombine.low %v2794_v3, %v3588_v25  ;;  %v2689_v25 = vld [vmem:[%s3442_s9 + $0x48] sm:$0xf]  ;;  %v1125_v3 = vshll.u32 %v3174_v55, 16  ;;  %v3184_v54 = vld [vmem:[%s3442_s9 + $0x5c] ss:$0 sps:$4 sm:$0x11]  }
  0x4b   : > { %1267 = vrot.lane.b32.xlu1 %v1116_v48, %s3352_s6  ;;  %v2860_v39 = vcombine.low %v2689_v25, %v2690_v28  ;;  %v845_v48 = vrot.slane %v3166_v10, 1  ;;  %v1122_v2 = vrot.slane %v1120_v41, 1  ;;  %v1354_v25 = vrot.slane %v3174_v55, 1  ;;  %v2693_v0 = vld [vmem:[%s3442_s9 + $0x60] sm:$0xf] }
  0x4c   : > { %v287_v9 = vld [vmem:[%s3442_s9 + $0x48] sm:$0xe] }
  0x4d   : > { %1265 = vrot.lane.b32.xlu0 %v1104_v53, %s3352_s6  ;;  %v1132_v50 = vshll.u32 %v2860_v39, 16  ;;  %v846_v58 = vsel %vm828_vm0, %v844_v46, %v845_v48  ;;  %v1130_v61 = vshrl.u32 %v2860_v39, 16  ;;  %v1123_v13 = vor.u32 %v1122_v2, %v1118_v1  ;;  %v2795_v46 = vld [vmem:[%s3442_s9 + $0x48] sm:$0xe] }
  0x4e   : > { %v2939_v55 = vcombine.low %v2795_v46, %v3671_v7  ;;  %v2757_v46 = vld [vmem:[%s3442_s9 + $0x6c] sm:$0xf] }
  0x4f   : > { %1395 = vrot.lane.b32.xlu1 %v1352_v60, %s3349_s13  ;;  %v2732_v60 = vld [vmem:[%s3442_s9 + $0x48] sm:$0xe]  ;;  %v1134_v62 = vrot.slane %v1132_v50, 1  ;;  %v1651_v50 = vrot.slane %v1649_v35, 1 }
  0x50   : > { %v2892_v8 = vcombine.low %v2732_v60, %v2690_v28  ;;  %v3215_v60 = vld [vmem:[%s4622_s1 + $0x20] ss:$0 sps:$4 sm:$0xff]  }
  0x51   : > { %1393 = vrot.lane.b32.xlu0 %v1349_v49, %s3349_s13  ;;  %v1137_v49 = vshll.u32 %v3173_v51, 16  ;;  %v1135_v4 = vor.u32 %v1134_v62, %v1130_v61  ;;  %3076 = vmatprep.subr.msk.bf16.mxu0 %vm2263_vm2, %v3215_v60 }
  0x52   : > { %v1356_v17 = vrot.slane %v2892_v8, 1  ;;  %v1866_v8 = vrot.slane %v3690_v26, 1 }
  0x53   : > { %1507 = vrot.lane.b32.xlu1 %v2906_v33, %s3353_s7  ;;  %v1862_v33 = vrot.slane %v2938_v14, 1  ;;  %v1139_v10 = vrot.slane %v1137_v49, 1  ;;  %v1127_v14 = vrot.slane %v1125_v3, 1 }
  0x55   : > { %1505 = vrot.lane.b32.xlu0 %v2905_v37, %s3353_s7  ;;  %v622_v37 = vor.u32 %v621_v24, %v617_v22  ;;  %v1864_v53 = vsel %vm828_vm0, %v1862_v33, %v1863_v42  ;;  %v3685_v22 = vcombine.low %v245_v11, %v3677_v12  ;;  %v1140_v24 = vsel %vm555_vm1, %v1135_v4, %v1139_v10  ;;  %v2691_v4 = vld [vmem:[%s3442_s9 + $0x54] sm:$0xf]  ;;  %v2692_v10 = vld [vmem:[%s3442_s9 + $0x58] sm:$0xf] }
  0x56   : > { %v1646_v33 = vrot.slane %v1644_v16, 1  ;;  %v2265_v11 = vsel %vm2263_vm2, %v3215_v60, 0 }
  0x57   : > { %1779 = vrot.lane.b32.xlu1 %v1628_v15, %s3354_s8  ;;  %v627_v45 = vsel %vm555_vm1, %v622_v37, %v626_v38  ;;  %v2907_v15 = vcombine.low %v2751_v6, %v3671_v7  ;;  %v631_v37 = vshll.u32 %v3685_v22, 16  ;;  %v1358_v38 = vsel %vm828_vm0, %v1356_v17, %v1357_v18  ;;  %v3730_v7 = vld [vmem:[%s3442_s9 + $0x64] sm:$0xf]  ;;  %3023 = vmatpush3.bf16.msra.mxu0 %v2265_v11  ;;  %v251_v11 = vld [vmem:[%s3442_s9 + $0x6c] sm:$0xf] }
  0x58   : > { %v1647_v48 = vor.u32 %v1646_v33, %v1642_v32  ;;  %v629_v51 = vshrl.u32 %v3685_v22, 16  ;;  %v648_v6 = vshll.u32 %v3184_v54, 16  ;;  %v3191_v32 = vld [vmem:[%s3442_s9 + $0x68] ss:$0 sps:$4 sm:$0x11]  }
  0x59   : > { %1777 = vrot.lane.b32.xlu0 %v1616_v27, %s3354_s8  ;;  %v1128_v27 = vsel %vm555_vm1, %v1123_v13, %v1127_v14  ;;  %v1632_v28 = vshll.u32 %v2907_v15, 16  ;;  %v1630_v42 = vshrl.u32 %v2907_v15, 16  ;;  %v2862_v14 = vcombine.low %v2693_v0, %v3730_v7  ;;  %v3192_v33 = vld [vmem:[%s3442_s9 + $0x5c] ss:$0 sps:$4 sm:$0x11]  }
  0x5a   : > { %v1652_v62 = vsel %vm555_vm1, %v1647_v48, %v1651_v50  ;;  %v650_v17 = vrot.slane %v648_v6, 1  ;;  %v3760_v48 = vld [vmem:[%s3442_s9 + $0x70] sm:$0xf]  ;;  %v3772_v0 = vld [vmem:[%s3442_s9 + $0x64] sm:$0xf] }
  0x5b   : > { %756 = vrot.lane.b32.xlu1 %v615_v36, %s3351_s25  ;;  %v3700_v36 = vld [vmem:[%s3442_s9 + $0x50] ss:$0 sps:$4 sm:$0x11]   ;;  %v1634_v43 = vrot.slane %v1632_v28, 1  ;;  %v851_v28 = vrot.slane %v3184_v54, 1 }
  0x5c   : > { %v636_v47 = vshll.u32 %v3700_v36, 16  ;;  %v2756_v54 = vld [vmem:[%s3442_s9 + $0x64] sm:$0xf] }
  0x5d   : > { %1905 = vrot.lane.b32.xlu0 %v1861_v40, %s3355_s11  ;;  %v1355_v40 = vsel %vm828_vm0, %v1353_v21, %v1354_v25  ;;  %v1635_v56 = vor.u32 %v1634_v43, %v1630_v42  ;;  %v1869_v21 = vrot.slane %v3682_v19, 1 }
  0x5e   : > { %v638_v49 = vrot.slane %v636_v47, 1  ;;  %v2755_v47 = vld [vmem:[%s3442_s9 + $0x60] sm:$0xf] }
  0x5f   : > { %758 = vrot.lane.b32.xlu1 %v627_v45, %s3351_s25  ;;  %v2796_v45 = vld [vmem:[%s3442_s9 + $0x54] sm:$0xe] }
  0x60   : > { %v2940_v61 = vcombine.low %v2796_v45, %v3661_v57  ;;  %v1149_v45 = vshll.u32 %v3192_v33, 16 }
  0x61   : > { %1907 = vrot.lane.b32.xlu0 %v1864_v53, %s3355_s11  ;;  %v633_v53 = vrot.slane %v631_v37, 1 }
  0x62   : > { %v1868_v18 = vrot.slane %v2940_v61, 1  ;;  %v1151_v61 = vrot.slane %v1149_v45, 1  ;;  %v2798_v45 = vld [vmem:[%s3442_s9 + $0x6c] sm:$0xe] }
  0x63   : > { %887 = vrot.lane.b32.xlu1 %v846_v58, %s3350_s14  ;;  %v634_v1 = vor.u32 %v633_v53, %v629_v51 }
  0x64   : > { %v1870_v19 = vsel %vm828_vm0, %v1868_v18, %v1869_v21 }
  0x65   : > { %885 = vrot.lane.b32.xlu0 %v843_v59, %s3350_s14  ;;  %v288_v59 = vld [vmem:[%s3442_s9 + $0x54] sm:$0xe] }
  0x66   : > { %v2846_v13 = vcombine.low %v288_v59, %v3695_v31  ;;  %v249_v59 = vld [vmem:[%s3442_s9 + $0x60] sm:$0xf] }
  0x67   : > { %999 = vrot.lane.b32.xlu1 %v2860_v39, %s3348_s10  ;;  %v3706_v39 = vcombine.low %v247_v30, %v3695_v31  ;;  %v1156_v30 = vshll.u32 %v2862_v14, 16 }
  0x68   : > { %v850_v25 = vrot.slane %v2846_v13, 1  ;;  %v3789_v13 = vld [vmem:[%s3442_s9 + $0x70] sm:$0xf] }
  0x69   : > { %997 = vrot.lane.b32.xlu0 %v2859_v44, %s3348_s10  ;;  %v1637_v44 = vshll.u32 %v3690_v26, 16  ;;  %v643_v41 = vshll.u32 %v3706_v39, 16  ;;  %v641_v2 = vshrl.u32 %v3706_v39, 16  ;;  %v2845_v26 = vcombine.low %v287_v9, %v3677_v12 }
  0x6a   : > { %v848_v12 = vrot.slane %v3700_v36, 1  ;;  %v1158_v42 = vrot.slane %v1156_v30, 1  ;;  %v852_v43 = vsel %vm828_vm0, %v850_v25, %v851_v28  ;;  %v2733_v36 = vld [vmem:[%s3442_s9 + $0x54] sm:$0xe] }
  0x6b   : > { %1271 = vrot.lane.b32.xlu1 %v1140_v24, %s3352_s6  ;;  %v1639_v58 = vrot.slane %v1637_v44, 1  ;;  %v645_v3 = vrot.slane %v643_v41, 1  ;;  %v847_v35 = vrot.slane %v2845_v26, 1  ;;  %v1161_v44 = vshll.u32 %v3191_v32, 16 }
  0x6c   : > { %v3801_v26 = vcombine.low %v251_v11, %v3789_v13 }
  0x6d   : > { %1269 = vrot.lane.b32.xlu0 %v1128_v27, %s3352_s6  ;;  %v1640_v57 = vsel %vm555_vm1, %v1635_v56, %v1639_v58  ;;  %v646_v16 = vor.u32 %v645_v3, %v641_v2  ;;  %v2861_v27 = vcombine.low %v2691_v4, %v2692_v10  ;;  %v849_v50 = vsel %vm828_vm0, %v847_v35, %v848_v12  ;;  %v3776_v3 = vld [vmem:[%s3442_s9 + $0x74] ss:$0 sps:$4 sm:$0x11]  }
  0x6e   : > { %v2893_v56 = vcombine.low %v2733_v36, %v2692_v10  ;;  %v1163_v60 = vrot.slane %v1161_v44, 1  ;;  %v1360_v4 = vrot.slane %v3192_v33, 1  ;;  %v3811_v12 = vld [vmem:[%s3442_s9 + $0x74] ss:$0 sps:$4 sm:$0x11]  }
  0x6f   : > { %1399 = vrot.lane.b32.xlu1 %v1358_v38, %s3349_s13  ;;  %v651_v31 = vsel %vm555_vm1, %v646_v16, %v650_v17  ;;  %v1144_v37 = vshll.u32 %v2861_v27, 16  ;;  %v2734_v38 = vld [vmem:[%s3442_s9 + $0x60] sm:$0xe]  ;;  %v1142_v51 = vshrl.u32 %v2861_v27, 16  ;;  %v1673_v17 = vshll.u32 %v3776_v3, 16 }
  0x70   : > { %v2894_v41 = vcombine.low %v2734_v38, %v3730_v7  ;;  %v1363_v7 = vrot.slane %v3191_v32, 1 }
  0x71   : > { %1397 = vrot.lane.b32.xlu0 %v1355_v40, %s3349_s13  ;;  %v1154_v40 = vshrl.u32 %v2862_v14, 16  ;;  %v1146_v53 = vrot.slane %v1144_v37, 1  ;;  %v1675_v35 = vrot.slane %v1673_v17, 1  ;;  %v2736_v17 = vld [vmem:[%s3442_s9 + $0x78] sm:$0xe] }
  0x73   : > { %1511 = vrot.lane.b32.xlu1 %v2908_v5, %s3353_s7  ;;  %v1865_v5 = vrot.slane %v2939_v55, 1  ;;  %v2910_v55 = vcombine.low %v2757_v46, %v3760_v48  ;;  %v1159_v58 = vor.u32 %v1158_v42, %v1154_v40  ;;  %v667_v42 = vshll.u32 %v3801_v26, 16 }
  0x75   : > { %1509 = vrot.lane.b32.xlu0 %v2907_v15, %s3353_s7  ;;  %v639_v15 = vsel %vm555_vm1, %v634_v1, %v638_v49  ;;  %v1867_v24 = vsel %vm828_vm0, %v1865_v5, %v1866_v8  ;;  %v2909_v49 = vcombine.low %v2755_v47, %v2756_v54  ;;  %v1362_v1 = vrot.slane %v2894_v41, 1  ;;  %v3781_v5 = vld [vmem:[%s3442_s9 + $0x68] ss:$0 sps:$4 sm:$0x11]  }
  0x76   : > { %v1668_v2 = vshll.u32 %v2910_v55, 16  ;;  %v1164_v6 = vsel %vm555_vm1, %v1159_v58, %v1163_v60  ;;  %v3784_v8 = vcombine.low %v249_v59, %v3772_v0  ;;  %v1661_v30 = vshll.u32 %v3781_v5, 16  ;;  %v289_v58 = vld [vmem:[%s3442_s9 + $0x60] sm:$0xe]  ;;  %v2697_v59 = vld [vmem:[%s3442_s9 + $0x78] sm:$0xf] }
  0x77   : > { %1783 = vrot.lane.b32.xlu1 %v1652_v62, %s3354_s8  ;;  %v1147_v62 = vor.u32 %v1146_v53, %v1142_v51  ;;  %v1656_v10 = vshll.u32 %v2909_v49, 16  ;;  %v1364_v18 = vsel %vm828_vm0, %v1362_v1, %v1363_v7  ;;  %v1654_v25 = vshrl.u32 %v2909_v49, 16  ;;  %v290_v53 = vld [vmem:[%s3442_s9 + $0x6c] sm:$0xe]  ;;  %v2698_v1 = vld [vmem:[%s3442_s9 + $0x7c] sm:$0xf] }
  0x78   : > { %v1670_v16 = vrot.slane %v1668_v2, 1  ;;  %v655_v21 = vshll.u32 %v3784_v8, 16  ;;  %v653_v37 = vshrl.u32 %v3784_v8, 16  ;;  %v1663_v44 = vrot.slane %v1661_v30, 1  ;;  %v2695_v2 = vld [vmem:[%s3442_s9 + $0x6c] sm:$0xf] }
  0x79   : > { %1781 = vrot.lane.b32.xlu0 %v1640_v57, %s3354_s8  ;;  %v1359_v57 = vrot.slane %v2893_v56, 1  ;;  %v1152_v9 = vsel %vm555_vm1, %v1147_v62, %v1151_v61  ;;  %v1658_v28 = vrot.slane %v1656_v10, 1  ;;  %v1872_v36 = vrot.slane %v3781_v5, 1 }
  0x7a   : > { %v657_v38 = vrot.slane %v655_v21, 1  ;;  %v672_v51 = vshll.u32 %v3811_v12, 16  ;;  %v669_v56 = vrot.slane %v667_v42, 1  ;;  %v2942_v60 = vcombine.low %v2798_v45, %v3760_v48  ;;  %v3878_v45 = vld [vmem:[%s3442_s9 + $0x88] sm:$0xf] }
  0x7b   : > { %760 = vrot.lane.b32.xlu1 %v639_v15, %s3351_s25  ;;  %v1666_v15 = vshrl.u32 %v2910_v55, 16  ;;  %v2848_v7 = vcombine.low %v290_v53, %v3789_v13  ;;  %v2847_v5 = vcombine.low %v289_v58, %v3772_v0  ;;  %v2759_v53 = vld [vmem:[%s3442_s9 + $0x78] sm:$0xf] }
  0x7c   : > { %v1874_v11 = vrot.slane %v2942_v60, 1 }
  0x7d   : > { %1909 = vrot.lane.b32.xlu0 %v1867_v24, %s3355_s11  ;;  %v3797_v24 = vld [vmem:[%s3442_s9 + $0x68] ss:$0 sps:$4 sm:$0x11]  }
  0x7e   : > { %v660_v40 = vshll.u32 %v3797_v24, 16  ;;  %v854_v0 = vrot.slane %v3797_v24, 1 }
  0x7f   : > { %762 = vrot.lane.b32.xlu1 %v651_v31, %s3351_s25 }
  0x80   : > { %v662_v41 = vrot.slane %v660_v40, 1 }
  0x81   : > { %1911 = vrot.lane.b32.xlu0 %v1870_v19, %s3355_s11  ;;  %v1671_v19 = vor.u32 %v1670_v16, %v1666_v15  ;;  %v857_v16 = vrot.slane %v3811_v12, 1  ;;  %v2735_v12 = vld [vmem:[%s3442_s9 + $0x6c] sm:$0xe] }
  0x83   : > { %891 = vrot.lane.b32.xlu1 %v852_v43, %s3350_s14  ;;  %v1659_v43 = vor.u32 %v1658_v28, %v1654_v25  ;;  %v1676_v46 = vsel %vm555_vm1, %v1671_v19, %v1675_v35  ;;  %v2896_v35 = vcombine.low %v2736_v17, %v2698_v1  ;;  %v2799_v17 = vld [vmem:[%s3442_s9 + $0x78] sm:$0xe] }
  0x85   : > { %889 = vrot.lane.b32.xlu0 %v849_v50, %s3350_s14  ;;  %v1664_v62 = vsel %vm555_vm1, %v1659_v43, %v1663_v44  ;;  %v2761_v44 = vld [vmem:[%s3442_s9 + $0x84] sm:$0xf]  ;;  %v1368_v58 = vrot.slane %v2896_v35, 1 }
  0x86   : > { %v3893_v60 = vcombine.low %v2761_v44, %v3878_v45 }
  0x87   : > { %1003 = vrot.lane.b32.xlu1 %v2862_v14, %s3348_s10  ;;  %v2797_v14 = vld [vmem:[%s3442_s9 + $0x60] sm:$0xe] }
  0x88   : > { %v2941_v33 = vcombine.low %v2797_v14, %v2756_v54  ;;  %v658_v54 = vor.u32 %v657_v38, %v653_v37  ;;  %v1875_v14 = vrot.slane %v3776_v3, 1  ;;  %v856_v3 = vrot.slane %v2848_v7, 1 }
  0x89   : > { %1001 = vrot.lane.b32.xlu0 %v2861_v27, %s3348_s10  ;;  %v1361_v27 = vsel %vm828_vm0, %v1359_v57, %v1360_v4 }
  0x8a   : > { %v1871_v50 = vrot.slane %v2941_v33, 1  ;;  %v663_v48 = vsel %vm555_vm1, %v658_v54, %v662_v41  ;;  %v1876_v30 = vsel %vm828_vm0, %v1874_v11, %v1875_v14  ;;  %v3867_v33 = vld [vmem:[%s3442_s9 + $0x74] ss:$0 sps:$4 sm:$0x11]   ;;  %v858_v40 = vsel %vm828_vm0, %v856_v3, %v857_v16  ;;  %v3886_v54 = vld [vmem:[%s3442_s9 + $0x7c] sm:$0xf] }
  0x8b   : > { %1275 = vrot.lane.b32.xlu1 %v1164_v6, %s3352_s6  ;;  %v3836_v6 = vld [vmem:[%s3442_s9 + $0x70] sm:$0xf]  ;;  %v1366_v11 = vrot.slane %v3867_v33, 1  ;;  %v1692_v14 = vshll.u32 %v3893_v60, 16  ;;  %v2943_v35 = vcombine.low %v2799_v17, %v3886_v54 }
  0x8c   : > { %v1873_v10 = vsel %vm828_vm0, %v1871_v50, %v1872_v36  ;;  %v3850_v13 = vcombine.low %v2695_v2, %v3836_v6 }
  0x8d   : > { %1273 = vrot.lane.b32.xlu0 %v1152_v9, %s3352_s6  ;;  %v3843_v9 = vcombine.low %v2697_v59, %v2698_v1  ;;  %v3899_v1 = vcombine.low %v2759_v53, %v3886_v54 }
  0x8e   : > { %v1168_v24 = vshll.u32 %v3850_v13, 16  ;;  %v1166_v43 = vshrl.u32 %v3850_v13, 16 }
  0x8f   : > { %1403 = vrot.lane.b32.xlu1 %v1364_v18, %s3349_s13  ;;  %v3806_v31 = vpop.permute.xlu1 %991  ;;  %v3857_v18 = vld [vmem:[%s3442_s9 + $0x80] ss:$0 sps:$4 sm:$0x11]   ;;  %v1180_v25 = vshll.u32 %v3843_v9, 16  ;;  %v1178_v37 = vshrl.u32 %v3843_v9, 16 }
  0x90   : > { %v3808_v32 = vpop.permute.xlu0 %989  ;;  %v1185_v38 = vshll.u32 %v3857_v18, 16  ;;  %v1170_v36 = vrot.slane %v1168_v24, 1 }
  0x91   : > { %1401 = vrot.lane.b32.xlu0 %v1361_v27, %s3349_s13  ;;  %v853_v27 = vrot.slane %v2847_v5, 1  ;;  %v1182_v42 = vrot.slane %v1180_v25, 1  ;;  %v255_v25 = vld [vmem:[%s3442_s9 + $0x84] sm:$0xf] }
  0x92   : > { %v1187_v59 = vrot.slane %v1185_v38, 1 }
  0x93   : > { %1515 = vrot.lane.b32.xlu1 %v2910_v55, %s3353_s7  ;;  %v665_v55 = vshrl.u32 %v3801_v26, 16  ;;  %v855_v50 = vsel %vm828_vm0, %v853_v27, %v854_v0 }
  0x94   : > { %v3824_v47 = vpop.permute.xlu0 %1389 }
  0x95   : > { %1513 = vrot.lane.b32.xlu0 %v2909_v49, %s3353_s7  ;;  %v3829_v61 = vpop.permute.xlu1 %877  ;;  %v674_v49 = vrot.slane %v672_v51, 1  ;;  %v670_v57 = vor.u32 %v669_v56, %v665_v55  ;;  %v1173_v51 = vshll.u32 %v3867_v33, 16  ;;  %v2895_v56 = vcombine.low %v2735_v12, %v3836_v6 }
  0x96   : > { %v1690_v12 = vshrl.u32 %v3893_v60, 16 }
  0x97   : > { %1787 = vrot.lane.b32.xlu1 %v1676_v46, %s3354_s8  ;;  %v675_v21 = vsel %vm555_vm1, %v670_v57, %v674_v49  ;;  %v1171_v49 = vor.u32 %v1170_v36, %v1166_v43  ;;  %v1175_v7 = vrot.slane %v1173_v51, 1  ;;  %v253_v57 = vld [vmem:[%s3442_s9 + $0x78] sm:$0xf] }
  0x99   : > { %1785 = vrot.lane.b32.xlu0 %v1664_v62, %s3354_s8  ;;  %v3845_v4 = vpop.permute.xlu1 %879  ;;  %v1176_v27 = vsel %vm555_vm1, %v1171_v49, %v1175_v7  ;;  %v3974_v49 = vld [vmem:[%s3442_s9 + $0x8c] ss:$0 sps:$4 sm:$0x11]  }
  0x9b   : > { %v749_v15 = vpop.permute.xlu0 %748  ;;  %764 = vrot.lane.b32.xlu1 %v663_v48, %s3351_s25  ;;  %v1369_v48 = vrot.slane %v3857_v18, 1  ;;  %v3927_v18 = vld [vmem:[%s3442_s9 + $0x80] ss:$0 sps:$4 sm:$0x11]  }
  0x9c   : > { %v1935_v41 = vsel %vm1933_vm3, %v3470_v23, %v749_v15  ;;  %v1183_v23 = vor.u32 %v1182_v42, %v1178_v37  ;;  %v3917_v15 = vld [vmem:[%s3442_s9 + $0x8c] ss:$0 sps:$4 sm:$0x11]   ;;  %v1694_v37 = vrot.slane %v1692_v14, 1 }
  0x9d   : > { %1913 = vrot.lane.b32.xlu0 %v1873_v10, %s3355_s11  ;;  %v3862_v28 = vpop.permute.xlu1 %1391  ;;  %v1968_v2 = vsel %vm1966_vm4, %v1935_v41, %v3829_v61  ;;  %v1365_v10 = vrot.slane %v2895_v56, 1  ;;  %v1697_v38 = vshll.u32 %v3917_v15, 16  ;;  %v2800_v56 = vld [vmem:[%s3442_s9 + $0x84] sm:$0xe] }
  0x9e   : > { %v2001_v16 = vsel %vm1999_vm5, %v1968_v2, %v3808_v32  ;;  %v1188_v0 = vsel %vm555_vm1, %v1183_v23, %v1187_v59  ;;  %v1370_v32 = vsel %vm828_vm0, %v1368_v58, %v1369_v48  ;;  %v1695_v58 = vor.u32 %v1694_v37, %v1690_v12 }
  0x9f   : > { %v751_v19 = vpop.permute.xlu0 %750  ;;  %766 = vrot.lane.b32.xlu1 %v675_v21, %s3351_s25  ;;  %v1367_v33 = vsel %vm828_vm0, %v1365_v10, %v1366_v11  ;;  %v1878_v10 = vrot.slane %v3927_v18, 1 }
  0xa0   : > { %v1937_v62 = vsel %vm1933_vm3, %v3475_v29, %v751_v19  ;;  %v3908_v29 = vld [vmem:[%s3442_s9 + $0x7c] sm:$0xf]  ;;  %v3943_v19 = vld [vmem:[%s3442_s9 + $0x80] ss:$0 sps:$4 sm:$0x11]  }
  0xa1   : > { %1915 = vrot.lane.b32.xlu0 %v1876_v30, %s3355_s11  ;;  %v3880_v46 = vpop.permute.xlu1 %1263  ;;  %v1970_v61 = vsel %vm1966_vm4, %v1937_v62, %v3845_v4  ;;  %v1680_v4 = vshll.u32 %v3899_v1, 16  ;;  %v684_v41 = vshll.u32 %v3943_v19, 16  ;;  %v1877_v62 = vrot.slane %v2943_v35, 1 }
  0xa2   : > { %v2003_v30 = vsel %vm1999_vm5, %v1970_v61, %v3806_v31 }
  0xa3   : > { %v1262_v55 = vpop.permute.xlu0 %1261  ;;  %895 = vrot.lane.b32.xlu1 %v858_v40, %s3350_s14  ;;  %v1678_v40 = vshrl.u32 %v3899_v1, 16  ;;  %v2036_v44 = vsel %vm2032_vm6, %v2003_v30, %v3880_v46  ;;  %v1682_v51 = vrot.slane %v1680_v4, 1  ;;  %v1699_v46 = vrot.slane %v1697_v38, 1  ;;  %v2701_v4 = vld [vmem:[%s3442_s9 + $0x90] sm:$0xf] }
  0xa4   : > { %v2034_v21 = vsel %vm2032_vm6, %v2001_v16, %v1262_v55  ;;  %v2069_v23 = vsel %vm2065_vm7, %v2036_v44, %v3862_v28  ;;  %v686_v14 = vrot.slane %v684_v41, 1  ;;  %v1881_v44 = vrot.slane %v3917_v15, 1  ;;  %v3232_v41 = vld [vmem:[%s3442_s9 + $0x98] ss:$0 sps:$4 sm:$0x11]  }
  0xa5   : > { %893 = vrot.lane.b32.xlu0 %v855_v50, %s3350_s14  ;;  %v3903_v6 = vpop.permute.xlu1 %1503  ;;  %v2067_v31 = vsel %vm2065_vm7, %v2034_v21, %v3824_v47  ;;  %v1685_v47 = vshll.u32 %v3927_v18, 16  ;;  %v1683_v28 = vor.u32 %v1682_v51, %v1678_v40  ;;  %v3991_v21 = vld [vmem:[%s3442_s9 + $0x94] sm:$0xf]  ;;  %v1700_v18 = vsel %vm555_vm1, %v1695_v58, %v1699_v46 }
  0xa6   : > { %v2102_v48 = vsel %vm2098_vm8, %v2069_v23, %v3903_v6  ;;  %v2944_v6 = vcombine.low %v2800_v56, %v3878_v45  ;;  %v860_v58 = vrot.slane %v3943_v19, 1 }
  0xa7   : > { %v1502_v5 = vpop.permute.xlu0 %1501  ;;  %1007 = vrot.lane.b32.xlu1 %v3843_v9, %s3348_s10  ;;  %v3930_v9 = vcombine.low %v253_v57, %v3908_v29 }
  0xa8   : > { %v2100_v50 = vsel %vm2098_vm8, %v2067_v31, %v1502_v5  ;;  %v1687_v5 = vrot.slane %v1685_v47, 1  ;;  %v2866_v31 = vcombine.low %v2701_v4, %v3991_v21  ;;  %v2763_v4 = vld [vmem:[%s3442_s9 + $0x90] sm:$0xf] }
  0xa9   : > { %1005 = vrot.lane.b32.xlu0 %v3850_v13, %s3348_s10  ;;  %v1776_v3 = vpop.permute.xlu1 %1775  ;;  %v3937_v13 = vld [vmem:[%s3442_s9 + $0x88] sm:$0xf]  ;;  %v679_v42 = vshll.u32 %v3930_v9, 16  ;;  %v677_v59 = vshrl.u32 %v3930_v9, 16 }
  0xaa   : > { %v3955_v43 = vcombine.low %v255_v25, %v3937_v13  ;;  %v2135_v11 = vsel %vm2131_vm9, %v2102_v48, %v1776_v3  ;;  %v291_v25 = vld [vmem:[%s3442_s9 + $0x78] sm:$0xe]  ;;  %v1688_v45 = vsel %vm555_vm1, %v1683_v28, %v1687_v5  ;;  %v1204_v15 = vshll.u32 %v2866_v31, 16  ;;  %v2737_v48 = vld [vmem:[%s3442_s9 + $0x84] sm:$0xe] }
  0xab   : > { %v1774_v24 = vpop.permute.xlu0 %1773  ;;  %1279 = vrot.lane.b32.xlu1 %v1188_v0, %s3352_s6  ;;  %v681_v2 = vrot.slane %v679_v42, 1  ;;  %v292_v0 = vld [vmem:[%s3442_s9 + $0x84] sm:$0xe]  ;;  %v1879_v42 = vsel %vm828_vm0, %v1877_v62, %v1878_v10  ;;  %v3233_v62 = vld [vmem:[%s3442_s9 + $0x8c] ss:$0 sps:$4 sm:$0x11]  }
  0xac   : > { %v2133_v53 = vsel %vm2131_vm9, %v2100_v50, %v1774_v24  ;;  %v691_v7 = vshll.u32 %v3955_v43, 16  ;;  %v689_v16 = vshrl.u32 %v3955_v43, 16  ;;  %v2850_v35 = vcombine.low %v292_v0, %v3937_v13 }
  0xad   : > { %1277 = vrot.lane.b32.xlu0 %v1176_v27, %s3352_s6  ;;  %v3960_v36 = vpop.permute.xlu1 %752  ;;  %v682_v3 = vor.u32 %v681_v2, %v677_v59  ;;  %v2849_v50 = vcombine.low %v291_v25, %v3908_v29  ;;  %v2738_v59 = vld [vmem:[%s3442_s9 + $0x90] sm:$0xe]  ;;  %v2765_v2 = vld [vmem:[%s3442_s9 + $0x9c] sm:$0xf]  ;;  %v1202_v28 = vshrl.u32 %v2866_v31, 16  ;;  %v1206_v5 = vrot.slane %v1204_v15, 1 }
  0xae   : > { %v693_v27 = vrot.slane %v691_v7, 1  ;;  %v4035_v7 = vld [vmem:[%s3442_s9 + $0xa0] sm:$0xf]  ;;  %v1209_v10 = vshll.u32 %v3232_v41, 16 }
  0xaf   : > { %v1902_v54 = vpop.permute.xlu0 %1901  ;;  %1407 = vrot.lane.b32.xlu1 %v1370_v32, %s3349_s13  ;;  %v696_v32 = vshll.u32 %v3974_v49, 16  ;;  %v687_v12 = vsel %vm555_vm1, %v682_v3, %v686_v14  ;;  %v859_v56 = vrot.slane %v2849_v50, 1  ;;  %v4066_v50 = vld [vmem:[%s3442_s9 + $0xa4] ss:$0 sps:$4 sm:$0x11]  }
  0xb0   : > { %v2166_v55 = vsel %vm2164_vm10, %v2133_v53, %v1902_v54  ;;  %v694_v37 = vor.u32 %v693_v27, %v689_v16  ;;  %v862_v53 = vrot.slane %v2850_v35, 1  ;;  %v863_v54 = vrot.slane %v3974_v49, 1  ;;  %v4061_v35 = vld [vmem:[%s3442_s9 + $0x94] sm:$0xf] }
  0xb1   : > { %1405 = vrot.lane.b32.xlu0 %v1367_v33, %s3349_s13  ;;  %3024 = vmatprep.mubr.msk.bf16.mxu0 %vm2230_vm11, %v2166_v55  ;;  %v3979_v57 = vpop.permute.xlu1 %754  ;;  %v4006_v33 = vld [vmem:[%s3442_s9 + $0x88] sm:$0xf]  ;;  %v698_v38 = vrot.slane %v696_v32, 1  ;;  %v1197_v16 = vshll.u32 %v3233_v62, 16  ;;  %v1207_v27 = vor.u32 %v1206_v5, %v1202_v28  ;;  %v1211_v32 = vrot.slane %v1209_v10, 1 }
  0xb2   : > { %v864_v49 = vsel %vm828_vm0, %v862_v53, %v863_v54  ;;  %v2897_v3 = vcombine.low %v2737_v48, %v4006_v33  ;;  %v4074_v54 = vld [vmem:[%s3442_s9 + $0x98] ss:$0 sps:$4 sm:$0x11]  }
  0xb3   : > { %v1904_v61 = vpop.permute.xlu0 %1903  ;;  %1519 = vrot.lane.b32.xlu1 %v3893_v60, %s3353_s7  ;;  %v2699_v60 = vld [vmem:[%s3442_s9 + $0x84] sm:$0xf]  ;;  %v699_v47 = vsel %vm555_vm1, %v694_v37, %v698_v38  ;;  %v1212_v53 = vsel %vm555_vm1, %v1207_v27, %v1211_v32  ;;  %v4097_v28 = vld [vmem:[%s3442_s9 + $0x98] ss:$0 sps:$4 sm:$0x11]  }
  0xb4   : > { %v2168_v17 = vsel %vm2164_vm10, %v2135_v11, %v1904_v61  ;;  %v2865_v13 = vcombine.low %v2699_v60, %v4006_v33  ;;  %v861_v11 = vsel %vm828_vm0, %v859_v56, %v860_v58  ;;  %v1375_v33 = vrot.slane %v3232_v41, 1  ;;  %v259_v58 = vld [vmem:[%s3442_s9 + $0x9c] sm:$0xf] }
  0xb5   : > { %1517 = vrot.lane.b32.xlu0 %v3899_v1, %s3353_s7  ;;  %3025 = vmatmul.mubr.msk.bf16.vlgmr.msra.gmra.mrb[0].mxu0 %vm2230_vm11, %v2168_v17  ;;  %v3999_v30 = vpop.permute.xlu1 %883  ;;  %v1880_v1 = vrot.slane %v2944_v6, 1  ;;  %v2898_v17 = vcombine.low %v2738_v59, %v3991_v21  ;;  %v4045_v6 = vcombine.low %v2765_v2, %v4035_v7  ;;  %v1199_v21 = vrot.slane %v1197_v16, 1  ;;  %v2802_v32 = vld [vmem:[%s3442_s9 + $0x9c] sm:$0xe] }
  0xb6   : > { %v1192_v46 = vshll.u32 %v2865_v13, 16  ;;  %v1190_v61 = vshrl.u32 %v2865_v13, 16 }
  0xb7   : > { %v4003_v24 = vpop.permute.xlu0 %881  ;;  %1791 = vrot.lane.b32.xlu1 %v1700_v18, %s3354_s8  ;;  %v1882_v55 = vsel %vm828_vm0, %v1880_v1, %v1881_v44  ;;  %v4049_v18 = vld [vmem:[%s3442_s9 + $0x94] sm:$0xf]  ;;  %v257_v1 = vld [vmem:[%s3442_s9 + $0x90] sm:$0xf]  ;;  %v1374_v37 = vrot.slane %v2898_v17, 1  ;;  %v1716_v38 = vshll.u32 %v4045_v6, 16 }
  0xb8   : > { %v1194_v14 = vrot.slane %v1192_v46, 1  ;;  %v4057_v60 = vcombine.low %v2763_v4, %v4049_v18  ;;  %v1372_v44 = vrot.slane %v3233_v62, 1  ;;  %v4077_v15 = vcombine.low %v257_v1, %v4061_v35  ;;  %v2801_v4 = vld [vmem:[%s3442_s9 + $0x90] sm:$0xe] }
  0xb9   : > { %1789 = vrot.lane.b32.xlu0 %v1688_v45, %s3354_s8  ;;  %v4013_v40 = vpop.permute.xlu1 %995  ;;  %v1376_v46 = vsel %vm828_vm0, %v1374_v37, %v1375_v33  ;;  %v1714_v62 = vshrl.u32 %v4045_v6, 16  ;;  %v1718_v59 = vrot.slane %v1716_v38, 1  ;;  %v4130_v37 = vld [vmem:[%s3442_s9 + $0xa4] ss:$0 sps:$4 sm:$0x11]  }
  0xba   : > { %v1195_v45 = vor.u32 %v1194_v14, %v1190_v61  ;;  %v1704_v56 = vshll.u32 %v4057_v60, 16  ;;  %v1702_v48 = vshrl.u32 %v4057_v60, 16  ;;  %v701_v1 = vshrl.u32 %v4077_v15, 16 }
  0xbb   : > { %v4019_v51 = vpop.permute.xlu0 %993  ;;  %768 = vrot.lane.b32.xlu1 %v687_v12, %s3351_s25 }
  0xbc   : > { %v1706_v16 = vrot.slane %v1704_v56, 1 }
  0xbd   : > { %1917 = vrot.lane.b32.xlu0 %v1879_v42, %s3355_s11  ;;  %v4026_v29 = vpop.permute.xlu1 %1267  ;;  %v1371_v42 = vrot.slane %v2897_v3, 1  ;;  %v1719_v3 = vor.u32 %v1718_v59, %v1714_v62  ;;  %v1884_v62 = vrot.slane %v4074_v54, 1  ;;  %v2705_v59 = vld [vmem:[%s3442_s9 + $0xa8] sm:$0xf] }
  0xbf   : > { %v1266_v23 = vpop.permute.xlu0 %1265  ;;  %770 = vrot.lane.b32.xlu1 %v699_v47, %s3351_s25  ;;  %v1939_v47 = vsel %vm1933_vm3, %v3532_v20, %v3960_v36  ;;  %v4085_v20 = vld [vmem:[%s3442_s9 + $0xa0] sm:$0xf]  ;;  %v1373_v2 = vsel %vm828_vm0, %v1371_v42, %v1372_v44  ;;  %v2945_v42 = vcombine.low %v2801_v4, %v4049_v18 }
  0xc0   : > { %v4106_v10 = vcombine.low %v259_v58, %v4085_v20 }
  0xc1   : > { %1919 = vrot.lane.b32.xlu0 %v1882_v55, %s3355_s11  ;;  %v4040_v19 = vpop.permute.xlu1 %1395  ;;  %v1200_v55 = vsel %vm555_vm1, %v1195_v45, %v1199_v21  ;;  %v708_v21 = vshll.u32 %v4097_v28, 16 }
  0xc3   : > { %v1394_v0 = vpop.permute.xlu0 %1393  ;;  %899 = vrot.lane.b32.xlu1 %v864_v49, %s3350_s14  ;;  %v1721_v49 = vshll.u32 %v4066_v50, 16  ;;  %v710_v56 = vrot.slane %v708_v21, 1  ;;  %v866_v21 = vrot.slane %v4097_v28, 1  ;;  %v4200_v28 = vld [vmem:[%s3442_s9 + $0xb8] sm:$0xf] }
  0xc5   : > { %897 = vrot.lane.b32.xlu0 %v861_v11, %s3350_s14  ;;  %v4054_v25 = vpop.permute.xlu1 %1507  ;;  %v1723_v45 = vrot.slane %v1721_v49, 1  ;;  %v2703_v49 = vld [vmem:[%s3442_s9 + $0x9c] sm:$0xf] }
  0xc7   : > { %v1506_v12 = vpop.permute.xlu0 %1505  ;;  %1011 = vrot.lane.b32.xlu1 %v2866_v31, %s3348_s10  ;;  %v1972_v31 = vsel %vm1966_vm4, %v1939_v47, %v4003_v24 }
  0xc8   : > { %v2005_v36 = vsel %vm1999_vm5, %v1972_v31, %v4019_v51  ;;  %v1941_v51 = vsel %vm1933_vm3, %v3545_v34, %v3979_v57  ;;  %v1709_v34 = vshll.u32 %v4074_v54, 16 }
  0xc9   : > { %1009 = vrot.lane.b32.xlu0 %v2865_v13, %s3348_s10  ;;  %v1780_v41 = vpop.permute.xlu1 %1779  ;;  %v2038_v24 = vsel %vm2032_vm6, %v2005_v36, %v1266_v23  ;;  %v703_v23 = vshll.u32 %v4077_v15, 16  ;;  %v1974_v11 = vsel %vm1966_vm4, %v1941_v51, %v3999_v30  ;;  %v294_v36 = vld [vmem:[%s3442_s9 + $0x9c] sm:$0xe] }
  0xca   : > { %v2071_v5 = vsel %vm2065_vm7, %v2038_v24, %v1394_v0  ;;  %v2007_v57 = vsel %vm1999_vm5, %v1974_v11, %v4013_v40  ;;  %v1711_v44 = vrot.slane %v1709_v34, 1  ;;  %v4156_v24 = vld [vmem:[%s3442_s9 + $0xac] sm:$0xf] }
  0xcb   : > { %v1778_v13 = vpop.permute.xlu0 %1777  ;;  %1283 = vrot.lane.b32.xlu1 %v1212_v53, %s3352_s6  ;;  %v2104_v61 = vsel %vm2098_vm8, %v2071_v5, %v1506_v12  ;;  %v2040_v27 = vsel %vm2032_vm6, %v2007_v57, %v4026_v29  ;;  %v705_v12 = vrot.slane %v703_v23, 1  ;;  %v715_v29 = vshll.u32 %v4106_v10, 16 }
  0xcc   : > { %v2137_v0 = vsel %vm2131_vm9, %v2104_v61, %v1778_v13  ;;  %v2073_v40 = vsel %vm2065_vm7, %v2040_v27, %v4040_v19  ;;  %v1707_v19 = vor.u32 %v1706_v16, %v1702_v48  ;;  %v4163_v48 = vld [vmem:[%s3442_s9 + $0xa0] sm:$0xf]  ;;  %v2852_v5 = vcombine.low %v294_v36, %v4085_v20 }
  0xcd   : > { %1281 = vrot.lane.b32.xlu0 %v1200_v55, %s3352_s6  ;;  %v4111_v14 = vpop.permute.xlu1 %756  ;;  %v2106_v33 = vsel %vm2098_vm8, %v2073_v40, %v4054_v25  ;;  %v2946_v55 = vcombine.low %v2802_v32, %v4035_v7  ;;  %v1724_v25 = vsel %vm555_vm1, %v1719_v3, %v1723_v45  ;;  %v706_v18 = vor.u32 %v705_v12, %v701_v1  ;;  %v4190_v40 = vld [vmem:[%s3442_s9 + $0xa4] ss:$0 sps:$4 sm:$0x11]  }
  0xce   : > { %v2139_v47 = vsel %vm2131_vm9, %v2106_v33, %v1780_v41  ;;  %v713_v41 = vshrl.u32 %v4106_v10, 16  ;;  %v717_v58 = vrot.slane %v715_v29, 1  ;;  %v720_v7 = vshll.u32 %v4130_v37, 16  ;;  %v2739_v33 = vld [vmem:[%s3442_s9 + $0x9c] sm:$0xe] }
  0xcf   : > { %v1906_v17 = vpop.permute.xlu0 %1905  ;;  %1411 = vrot.lane.b32.xlu1 %v1376_v46, %s3349_s13  ;;  %v1883_v46 = vrot.slane %v2945_v42, 1  ;;  %v1886_v51 = vrot.slane %v2946_v55, 1  ;;  %v711_v23 = vsel %vm555_vm1, %v706_v18, %v710_v56  ;;  %v2868_v61 = vcombine.low %v2705_v59, %v4156_v24 }
  0xd0   : > { %v2170_v30 = vsel %vm2164_vm10, %v2137_v0, %v1906_v17  ;;  %v718_v54 = vor.u32 %v717_v58, %v713_v41  ;;  %v722_v11 = vrot.slane %v720_v7, 1  ;;  %v1887_v57 = vrot.slane %v4066_v50, 1  ;;  %v2767_v58 = vld [vmem:[%s3442_s9 + $0xa8] sm:$0xf]  ;;  %v4209_v7 = vld [vmem:[%s3442_s9 + $0xac] sm:$0xf] }
  0xd1   : > { %1409 = vrot.lane.b32.xlu0 %v1373_v2, %s3349_s13  ;;  %3028 = vmatprep.mubr.msk.bf16.mxu0 %vm2230_vm11, %v2170_v30  ;;  %v4135_v38 = vpop.permute.xlu1 %758  ;;  %v293_v2 = vld [vmem:[%s3442_s9 + $0x90] sm:$0xe]  ;;  %v1885_v34 = vsel %vm828_vm0, %v1883_v46, %v1884_v62  ;;  %v2867_v20 = vcombine.low %v2703_v49, %v4163_v48  ;;  %v868_v3 = vrot.slane %v2852_v5, 1  ;;  %v869_v27 = vrot.slane %v4130_v37, 1  ;;  %v2740_v37 = vld [vmem:[%s3442_s9 + $0xa8] sm:$0xe] }
  0xd2   : > { %v2851_v0 = vcombine.low %v293_v2, %v4061_v35  ;;  %v723_v4 = vsel %vm555_vm1, %v718_v54, %v722_v11  ;;  %v4183_v30 = vld [vmem:[%s3442_s9 + $0xb0] ss:$0 sps:$4 sm:$0x11]   ;;  %v1228_v50 = vshll.u32 %v2868_v61, 16  ;;  %v1888_v32 = vsel %vm828_vm0, %v1886_v51, %v1887_v57  ;;  %v261_v51 = vld [vmem:[%s3442_s9 + $0xa8] sm:$0xf] }
  0xd3   : > { %v1908_v53 = vpop.permute.xlu0 %1907  ;;  %1523 = vrot.lane.b32.xlu1 %v4045_v6, %s3353_s7  ;;  %v1712_v6 = vsel %vm555_vm1, %v1707_v19, %v1711_v44  ;;  %v1216_v1 = vshll.u32 %v2867_v20, 16  ;;  %v1226_v29 = vshrl.u32 %v2868_v61, 16  ;;  %v870_v42 = vsel %vm828_vm0, %v868_v3, %v869_v27  ;;  %v4224_v5 = vld [vmem:[%s3442_s9 + $0xac] sm:$0xf] }
  0xd4   : > { %v2172_v31 = vsel %vm2164_vm10, %v2139_v47, %v1908_v53  ;;  %v865_v45 = vrot.slane %v2851_v0, 1  ;;  %v1230_v19 = vrot.slane %v1228_v50, 1  ;;  %v1233_v44 = vshll.u32 %v4183_v30, 16  ;;  %v2769_v47 = vld [vmem:[%s3442_s9 + $0xb4] sm:$0xf] }
  0xd5   : > { %1521 = vrot.lane.b32.xlu0 %v4057_v60, %s3353_s7  ;;  %3029 = vmatmul.mubr.msk.bf16.gmra.mrb[4].mxu0 %vm2230_vm11, %v2172_v31  ;;  %v4150_v13 = vpop.permute.xlu1 %887  ;;  %v1214_v55 = vshrl.u32 %v2867_v20, 16  ;;  %v1221_v56 = vshll.u32 %v4190_v40, 16  ;;  %v2900_v41 = vcombine.low %v2740_v37, %v4156_v24  ;;  %v2899_v36 = vcombine.low %v2739_v33, %v4163_v48  ;;  %v4228_v11 = vld [vmem:[%s3442_s9 + $0xbc] ss:$0 sps:$4 sm:$0x11]  }
  0xd6   : > { %v867_v31 = vsel %vm828_vm0, %v865_v45, %v866_v21  ;;  %v1231_v46 = vor.u32 %v1230_v19, %v1226_v29  ;;  %v1235_v62 = vrot.slane %v1233_v44, 1  ;;  %v4220_v49 = vcombine.low %v2767_v58, %v4209_v7  ;;  %v4239_v27 = vld [vmem:[%s3442_s9 + $0xb0] ss:$0 sps:$4 sm:$0x11]   ;;  %v263_v21 = vld [vmem:[%s3442_s9 + $0xb4] sm:$0xf] }
  0xd7   : > { %v4158_v60 = vpop.permute.xlu0 %885  ;;  %1795 = vrot.lane.b32.xlu1 %v1724_v25, %s3354_s8  ;;  %v1218_v25 = vrot.slane %v1216_v1, 1  ;;  %v1223_v24 = vrot.slane %v1221_v56, 1  ;;  %v1380_v48 = vrot.slane %v2900_v41, 1  ;;  %v1381_v54 = vrot.slane %v4183_v30, 1 }
  0xd8   : > { %v1378_v57 = vrot.slane %v4190_v40, 1  ;;  %v1236_v3 = vsel %vm555_vm1, %v1231_v46, %v1235_v62  ;;  %v4242_v30 = vcombine.low %v261_v51, %v4224_v5  ;;  %v1728_v45 = vshll.u32 %v4220_v49, 16 }
  0xd9   : > { %1793 = vrot.lane.b32.xlu0 %v1712_v6, %s3354_s8  ;;  %v4170_v16 = vpop.permute.xlu1 %999  ;;  %v4214_v6 = vcombine.low %v2769_v47, %v4200_v28  ;;  %v1219_v2 = vor.u32 %v1218_v25, %v1214_v55  ;;  %v1382_v40 = vsel %vm828_vm0, %v1380_v48, %v1381_v54  ;;  %v1745_v29 = vshll.u32 %v4228_v11, 16  ;;  %v4295_v48 = vld [vmem:[%s3442_s9 + $0xbc] ss:$0 sps:$4 sm:$0x11]  }
  0xda   : > { %v1726_v19 = vshrl.u32 %v4220_v49, 16  ;;  %v727_v47 = vshll.u32 %v4242_v30, 16  ;;  %v1730_v41 = vrot.slane %v1728_v45, 1  ;;  %v725_v51 = vshrl.u32 %v4242_v30, 16 }
  0xdb   : > { %v4176_v17 = vpop.permute.xlu0 %997  ;;  %772 = vrot.lane.b32.xlu1 %v711_v23, %s3351_s25  ;;  %v1740_v0 = vshll.u32 %v4214_v6, 16  ;;  %v1738_v1 = vshrl.u32 %v4214_v6, 16  ;;  %v1890_v45 = vrot.slane %v4239_v27, 1 }
  0xdd   : > { %1921 = vrot.lane.b32.xlu0 %v1885_v34, %s3355_s11  ;;  %v4185_v35 = vpop.permute.xlu1 %1271  ;;  %v1377_v34 = vrot.slane %v2899_v36, 1  ;;  %v1747_v36 = vrot.slane %v1745_v29, 1 }
  0xdf   : > { %v1270_v12 = vpop.permute.xlu0 %1269  ;;  %774 = vrot.lane.b32.xlu1 %v723_v4, %s3351_s25  ;;  %v1943_v4 = vsel %vm1933_vm3, %v3609_v52, %v4111_v14  ;;  %v4250_v52 = vld [vmem:[%s3442_s9 + $0xb8] sm:$0xf]  ;;  %v1379_v33 = vsel %vm828_vm0, %v1377_v34, %v1378_v57 }
  0xe1   : > { %1923 = vrot.lane.b32.xlu0 %v1888_v32, %s3355_s11  ;;  %v4202_v53 = vpop.permute.xlu1 %1399  ;;  %v1224_v32 = vsel %vm555_vm1, %v1219_v2, %v1223_v24 }
  0xe3   : > { %v1398_v18 = vpop.permute.xlu0 %1397  ;;  %903 = vrot.lane.b32.xlu1 %v870_v42, %s3350_s14  ;;  %v1742_v42 = vrot.slane %v1740_v0, 1 }
  0xe5   : > { %901 = vrot.lane.b32.xlu0 %v867_v31, %s3350_s14  ;;  %v4217_v59 = vpop.permute.xlu1 %1511  ;;  %v2803_v31 = vld [vmem:[%s3442_s9 + $0xa8] sm:$0xe]  ;;  %v1743_v2 = vor.u32 %v1742_v42, %v1738_v1  ;;  %v2707_v42 = vld [vmem:[%s3442_s9 + $0xb4] sm:$0xf] }
  0xe6   : > { %v2947_v24 = vcombine.low %v2803_v31, %v4209_v7  ;;  %v1731_v7 = vor.u32 %v1730_v41, %v1726_v19  ;;  %v4328_v19 = vld [vmem:[%s3442_s9 + $0xb8] sm:$0xf] }
  0xe7   : > { %v1510_v23 = vpop.permute.xlu0 %1509  ;;  %1015 = vrot.lane.b32.xlu1 %v2868_v61, %s3348_s10  ;;  %v1976_v61 = vsel %vm1966_vm4, %v1943_v4, %v4158_v60  ;;  %v4258_v60 = vld [vmem:[%s3442_s9 + $0xb0] ss:$0 sps:$4 sm:$0x11]  }
  0xe8   : > { %v2009_v14 = vsel %vm1999_vm5, %v1976_v61, %v4176_v17  ;;  %v1945_v17 = vsel %vm1933_vm3, %v3623_v63, %v4135_v38  ;;  %v1733_v63 = vshll.u32 %v4239_v27, 16  ;;  %v732_v46 = vshll.u32 %v4258_v60, 16  ;;  %v2709_v27 = vld [vmem:[%s3442_s9 + $0xc0] sm:$0xf] }
  0xe9   : > { %1013 = vrot.lane.b32.xlu0 %v2867_v20, %s3348_s10  ;;  %v1784_v50 = vpop.permute.xlu1 %1783  ;;  %v2042_v37 = vsel %vm2032_vm6, %v2009_v14, %v1270_v12  ;;  %v4272_v12 = vcombine.low %v263_v21, %v4250_v52  ;;  %v1978_v55 = vsel %vm1966_vm4, %v1945_v17, %v4150_v13 }
  0xea   : > { %v2075_v44 = vsel %vm2065_vm7, %v2042_v37, %v1398_v18  ;;  %v2011_v38 = vsel %vm1999_vm5, %v1978_v55, %v4170_v16  ;;  %v1735_v57 = vrot.slane %v1733_v63, 1  ;;  %v734_v4 = vrot.slane %v732_v46, 1  ;;  %v4321_v37 = vld [vmem:[%s3442_s9 + $0xc4] sm:$0xf] }
  0xeb   : > { %v1782_v20 = vpop.permute.xlu0 %1781  ;;  %1287 = vrot.lane.b32.xlu1 %v1236_v3, %s3352_s6  ;;  %v2108_v25 = vsel %vm2098_vm8, %v2075_v44, %v1510_v23  ;;  %v2044_v13 = vsel %vm2032_vm6, %v2011_v38, %v4185_v35  ;;  %v729_v23 = vrot.slane %v727_v47, 1  ;;  %v739_v35 = vshll.u32 %v4272_v12, 16  ;;  %v2804_v3 = vld [vmem:[%s3442_s9 + $0xb4] sm:$0xe] }
  0xec   : > { %v2141_v18 = vsel %vm2131_vm9, %v2108_v25, %v1782_v20  ;;  %v2077_v16 = vsel %vm2065_vm7, %v2044_v13, %v4202_v53  ;;  %v737_v21 = vshrl.u32 %v4272_v12, 16  ;;  %v744_v20 = vshll.u32 %v4295_v48, 16  ;;  %v3266_v13 = vld [vmem:[%s3442_s9 + $0xc8] ss:$0 sps:$4 sm:$0x11]  }
  0xed   : > { %1285 = vrot.lane.b32.xlu0 %v1224_v32, %s3352_s6  ;;  %v4277_v56 = vpop.permute.xlu1 %760  ;;  %v2110_v54 = vsel %vm2098_vm8, %v2077_v16, %v4217_v59  ;;  %v1748_v32 = vsel %vm555_vm1, %v1743_v2, %v1747_v36  ;;  %v1889_v59 = vrot.slane %v2947_v24, 1  ;;  %v741_v14 = vrot.slane %v739_v35, 1  ;;  %v3267_v16 = vld [vmem:[%s3442_s9 + $0xbc] ss:$0 sps:$4 sm:$0x11]  }
  0xee   : > { %v2143_v53 = vsel %vm2131_vm9, %v2110_v54, %v1784_v50  ;;  %v730_v50 = vor.u32 %v729_v23, %v725_v51  ;;  %v1736_v1 = vsel %vm555_vm1, %v1731_v7, %v1735_v57  ;;  %v2948_v29 = vcombine.low %v2804_v3, %v4200_v28  ;;  %v2742_v35 = vld [vmem:[%s3442_s9 + $0xc0] sm:$0xe] }
  0xef   : > { %v1910_v58 = vpop.permute.xlu0 %1909  ;;  %1415 = vrot.lane.b32.xlu1 %v1382_v40, %s3349_s13  ;;  %v1891_v17 = vsel %vm828_vm0, %v1889_v59, %v1890_v45  ;;  %v742_v47 = vor.u32 %v741_v14, %v737_v21  ;;  %v746_v31 = vrot.slane %v744_v20, 1  ;;  %v2870_v55 = vcombine.low %v2709_v27, %v4321_v37  ;;  %v4361_v59 = vld [vmem:[%s3442_s9 + $0xd0] sm:$0xf]  ;;  %v4365_v21 = vld [vmem:[%s3442_s9 + $0xc4] sm:$0xf] }
  0xf0   : > { %v2174_v62 = vsel %vm2164_vm10, %v2141_v18, %v1910_v58  ;;  %v735_v28 = vsel %vm555_vm1, %v730_v50, %v734_v4  ;;  %v1892_v41 = vrot.slane %v2948_v29, 1  ;;  %v1893_v63 = vrot.slane %v4228_v11, 1  ;;  %v2771_v50 = vld [vmem:[%s3442_s9 + $0xc0] sm:$0xf] }
  0xf1   : > { %1413 = vrot.lane.b32.xlu0 %v1379_v33, %s3349_s13  ;;  %3032 = vmatprep.mubr.msk.bf16.mxu0 %vm2230_vm11, %v2174_v62  ;;  %v4300_v34 = vpop.permute.xlu1 %762  ;;  %v2869_v18 = vcombine.low %v2707_v42, %v4328_v19  ;;  %v747_v58 = vsel %vm555_vm1, %v742_v47, %v746_v31  ;;  %v875_v46 = vrot.slane %v4295_v48, 1  ;;  %v1252_v62 = vshll.u32 %v2870_v55, 16  ;;  %v2741_v48 = vld [vmem:[%s3442_s9 + $0xb4] sm:$0xe] }
  0xf2   : > { %v872_v24 = vrot.slane %v4258_v60, 1  ;;  %v1250_v7 = vshrl.u32 %v2870_v55, 16  ;;  %v2902_v14 = vcombine.low %v2742_v35, %v4321_v37  ;;  %v2901_v20 = vcombine.low %v2741_v48, %v4328_v19 }
  0xf3   : > { %v1912_v0 = vpop.permute.xlu0 %1911  ;;  %1527 = vrot.lane.b32.xlu1 %v4214_v6, %s3353_s7  ;;  %v296_v6 = vld [vmem:[%s3442_s9 + $0xb4] sm:$0xe]  ;;  %v1240_v51 = vshll.u32 %v2869_v18, 16  ;;  %v1254_v57 = vrot.slane %v1252_v62, 1  ;;  %v1238_v3 = vshrl.u32 %v2869_v18, 16  ;;  %v1387_v47 = vrot.slane %v3266_v13, 1 }
  0xf4   : > { %v2176_v61 = vsel %vm2164_vm10, %v2143_v53, %v1912_v0  ;;  %v2854_v44 = vcombine.low %v296_v6, %v4250_v52  ;;  %v1257_v53 = vshll.u32 %v3266_v13, 16  ;;  %v2773_v0 = vld [vmem:[%s3442_s9 + $0xcc] sm:$0xf]  ;;  %v1386_v37 = vrot.slane %v2902_v14, 1 }
  0xf5   : > { %1525 = vrot.lane.b32.xlu0 %v4220_v49, %s3353_s7  ;;  %3033 = vmatmul.mubr.msk.bf16.gmra.mrb[8].mxu0 %vm2230_vm11, %v2176_v61  ;;  %v4315_v40 = vpop.permute.xlu1 %891  ;;  %v295_v49 = vld [vmem:[%s3442_s9 + $0xa8] sm:$0xe]  ;;  %v1242_v61 = vrot.slane %v1240_v51, 1  ;;  %v1255_v6 = vor.u32 %v1254_v57, %v1250_v7  ;;  %v2918_v29 = vcombine.low %v2773_v0, %v4361_v59  ;;  %v1383_v19 = vrot.slane %v2901_v20, 1  ;;  %v2806_v57 = vld [vmem:[%s3442_s9 + $0xcc] sm:$0xe] }
  0xf6   : > { %v2853_v38 = vcombine.low %v295_v49, %v4224_v5  ;;  %v874_v36 = vrot.slane %v2854_v44, 1  ;;  %v1894_v5 = vsel %vm828_vm0, %v1892_v41, %v1893_v63  ;;  %v1384_v31 = vrot.slane %v3267_v16, 1  ;;  %v2805_v0 = vld [vmem:[%s3442_s9 + $0xc0] sm:$0xe] }
  0xf7   : > { %v4323_v33 = vpop.permute.xlu0 %889  ;;  %1799 = vrot.lane.b32.xlu1 %v1748_v32, %s3354_s8  ;;  %v1245_v32 = vshll.u32 %v3267_v16, 16  ;;  %v1243_v49 = vor.u32 %v1242_v61, %v1238_v3  ;;  %v1947_v41 = vsel %vm1933_vm3, %v3685_v22, %v4277_v56  ;;  %v1388_v56 = vsel %vm828_vm0, %v1386_v37, %v1387_v47 }
  0xf8   : > { %v871_v2 = vrot.slane %v2853_v38, 1  ;;  %v876_v54 = vsel %vm828_vm0, %v874_v36, %v875_v46  ;;  %v1764_v38 = vshll.u32 %v2918_v29, 16  ;;  %v2949_v20 = vcombine.low %v2805_v0, %v4365_v21 }
  0xf9   : > { %1797 = vrot.lane.b32.xlu0 %v1736_v1, %s3354_s8  ;;  %v4336_v25 = vpop.permute.xlu1 %1003  ;;  %v1259_v1 = vrot.slane %v1257_v53, 1  ;;  %v1247_v42 = vrot.slane %v1245_v32, 1  ;;  %v2950_v32 = vcombine.low %v2806_v57, %v4361_v59 }
  0xfa   : > { %v873_v60 = vsel %vm828_vm0, %v871_v2, %v872_v24  ;;  %v1762_v2 = vshrl.u32 %v2918_v29, 16  ;;  %v1949_v24 = vsel %vm1933_vm3, %v3706_v39, %v4300_v34  ;;  %v1766_v16 = vrot.slane %v1764_v38, 1 }
  0xfb   : > { %v1002_v52 = vpop.permute.xlu0 %1001  ;;  %776 = vrot.lane.b32.xlu1 %v735_v28, %s3351_s25  ;;  %v4374_v28 = vld [vmem:[%s3442_s9 + $0xd4] ss:$0 sps:$4 sm:$0x11]   ;;  %v1260_v63 = vsel %vm555_vm1, %v1255_v6, %v1259_v1  ;;  %v1248_v46 = vsel %vm555_vm1, %v1243_v49, %v1247_v42  ;;  %v1898_v49 = vrot.slane %v2950_v32, 1 }
  0xfc   : > { %v1767_v61 = vor.u32 %v1766_v16, %v1762_v2 }
  0xfd   : > { %1925 = vrot.lane.b32.xlu0 %v1891_v17, %s3355_s11  ;;  %v4346_v11 = vpop.permute.xlu1 %1275  ;;  %v2917_v17 = vcombine.low %v2771_v50, %v4365_v21  ;;  %v1895_v21 = vrot.slane %v2949_v20, 1 }
  0xff   : > { %v1274_v23 = vpop.permute.xlu0 %1273  ;;  %778 = vrot.lane.b32.xlu1 %v747_v58, %s3351_s25  ;;  %v1980_v58 = vsel %vm1966_vm4, %v1947_v41, %v4323_v33  ;;  %v1752_v62 = vshll.u32 %v2917_v17, 16  ;;  %v1769_v33 = vshll.u32 %v4374_v28, 16  ;;  %v1750_v51 = vshrl.u32 %v2917_v17, 16 }
 0x100   : > { %v2013_v13 = vsel %vm1999_vm5, %v1980_v58, %v1002_v52 }
 0x101   : > { %1927 = vrot.lane.b32.xlu0 %v1894_v5, %s3355_s11  ;;  %v4357_v4 = vpop.permute.xlu1 %1403  ;;  %v2046_v22 = vsel %vm2032_vm6, %v2013_v13, %v1274_v23  ;;  %v1982_v23 = vsel %vm1966_vm4, %v1949_v24, %v4315_v40 }
 0x102   : > { %v2015_v53 = vsel %vm1999_vm5, %v1982_v23, %v4336_v25  ;;  %v1771_v25 = vrot.slane %v1769_v33, 1 }
 0x103   : > { %v1402_v45 = vpop.permute.xlu0 %1401  ;;  %907 = vrot.lane.b32.xlu1 %v876_v54, %s3350_s14  ;;  %v1754_v54 = vrot.slane %v1752_v62, 1 }
 0x104   : > { %v2079_v52 = vsel %vm2065_vm7, %v2046_v22, %v1402_v45  ;;  %v1772_v59 = vsel %vm555_vm1, %v1767_v61, %v1771_v25 }
 0x105   : > { %905 = vrot.lane.b32.xlu0 %v873_v60, %s3350_s14  ;;  %v1516_v27 = vpop.permute.xlu1 %1515  ;;  %v2048_v60 = vsel %vm2032_vm6, %v2015_v53, %v4346_v11  ;;  %v1755_v14 = vor.u32 %v1754_v54, %v1750_v51 }
 0x106   : > { %v2081_v40 = vsel %vm2065_vm7, %v2048_v60, %v4357_v4 }
 0x107   : > { %v1514_v44 = vpop.permute.xlu0 %1513  ;;  %1019 = vrot.lane.b32.xlu1 %v2870_v55, %s3348_s10  ;;  %v3273_v55 = vld [vmem:[%s3442_s9 + $0xc8] ss:$0 sps:$4 sm:$0x11]   ;;  %v2114_v45 = vsel %vm2098_vm8, %v2081_v40, %v1516_v27  ;;  %v1899_v27 = vrot.slane %v4374_v28, 1 }
 0x108   : > { %v2112_v35 = vsel %vm2098_vm8, %v2079_v52, %v1514_v44  ;;  %v1757_v7 = vshll.u32 %v3273_v55, 16  ;;  %v1896_v37 = vrot.slane %v3273_v55, 1 }
 0x109   : > { %1017 = vrot.lane.b32.xlu0 %v2869_v18, %s3348_s10  ;;  %v1788_v36 = vpop.permute.xlu1 %1787  ;;  %v1385_v18 = vsel %vm828_vm0, %v1383_v19, %v1384_v31 }
 0x10a   : > { %v1759_v11 = vrot.slane %v1757_v7, 1  ;;  %v2147_v6 = vsel %vm2131_vm9, %v2114_v45, %v1788_v36  ;;  %v1897_v19 = vsel %vm828_vm0, %v1895_v21, %v1896_v37 }
 0x10b   : > { %v1786_v5 = vpop.permute.xlu0 %1785  ;;  %1291 = vrot.lane.b32.xlu1 %v1260_v63, %s3352_s6 }
 0x10c   : > { %v2145_v39 = vsel %vm2131_vm9, %v2112_v35, %v1786_v5  ;;  %v1760_v44 = vsel %vm555_vm1, %v1755_v14, %v1759_v11 }
 0x10d   : > { %1289 = vrot.lane.b32.xlu0 %v1248_v46, %s3352_s6  ;;  %v765_v48 = vpop.permute.xlu1 %764  ;;  %s4579_s6 = scalar_lea.hbm %s4626_s5, %s2981_s17 }
 0x10e   : > { %v1951_v46 = vsel %vm1933_vm3, %v3784_v8, %v765_v48 }
 0x10f   : > { %v1914_v34 = vpop.permute.xlu0 %1913  ;;  %1419 = vrot.lane.b32.xlu1 %v1388_v56, %s3349_s13 }
 0x110   : > { %v2178_v3 = vsel %vm2164_vm10, %v2145_v39, %v1914_v34 }
 0x111   : > { %1417 = vrot.lane.b32.xlu0 %v1385_v18, %s3349_s13  ;;  %3036 = vmatprep.mubr.msk.bf16.mxu0 %vm2230_vm11, %v2178_v3  ;;  %v767_v50 = vpop.permute.xlu1 %766  ;;  %s215_s13 = sand.u32 1, %s3338_s19  }
 0x112   : > { %v1953_v22 = vsel %vm1933_vm3, %v3801_v26, %v767_v50  ;;  %s216_s23 = scalar_lea.vmem [#allocation2], %s215_s13 }
 0x113   : > { %v1916_v1 = vpop.permute.xlu0 %1915  ;;  %1531 = vrot.lane.b32.xlu1 %v2918_v29, %s3353_s7  ;;  %v1900_v29 = vsel %vm828_vm0, %v1898_v49, %v1899_v27  ;;  %s2619_s25 = sshll.u32 %s216_s23, 4  ;;  %s4581_s25 = int_to_ptr.vmem [resolvable:$true] %s2619_s25 }
 0x114   : > { %v2180_v4 = vsel %vm2164_vm10, %v2147_v6, %v1916_v1  ;;  %s3284_s22 = scalar_lea.vmem %s4581_s25, 16 }
 0x115   : > { %1529 = vrot.lane.b32.xlu0 %v2917_v17, %s3353_s7  ;;  %3037 = vmatmul.mubr.msk.bf16.gmra.mrb[12].mxu0 %vm2230_vm11, %v2180_v4  ;;  %v896_v42 = vpop.permute.xlu1 %895  ;;  %s2607_s7 = scalar_lea.sflag [#allocation3], %s215_s13  ;;  %p3285_p11 = scmp.ne.s32.totalorder %s4581_s25, %s3284_s22 }
 0x116   : > { %v1986_v18 = vsel %vm1966_vm4, %v1953_v22, %v896_v42 }
 0x117   : > { %v894_v47 = vpop.permute.xlu0 %893  ;;  %1803 = vrot.lane.b32.xlu1 %v1772_v59, %s3354_s8  ;;  %p3286_p12 = pnand %p3285_p11, %p3427_p5 }
 0x118   : > { %v1984_v55 = vsel %vm1966_vm4, %v1951_v46, %v894_v47 }
 0x119   : > { %1801 = vrot.lane.b32.xlu0 %v1760_v44, %s3354_s8  ;;  %v1008_v17 = vpop.permute.xlu1 %1007  ;;  %p3287_p13 = pneg %p3286_p12  ;;  %s3358_s8 = smov [#allocation2]  }
 0x11a   : > { %v2019_v8 = vsel %vm1999_vm5, %v1986_v18, %v1008_v17 }
 0x11b   : > { %v1006_v31 = vpop.permute.xlu0 %1005  ;;  %1931 = vrot.lane.b32.xlu1 %v1900_v29, %s3355_s11 }
 0x11c   : > { %v2017_v13 = vsel %vm1999_vm5, %v1984_v55, %v1006_v31 }
 0x11d   : > { %1929 = vrot.lane.b32.xlu0 %v1897_v19, %s3355_s11  ;;  %v1280_v28 = vpop.permute.xlu1 %1279  ;;  %s3288_s11 = sshll.u32 %s3358_s8, 4  ;;  %s3289_s11 = int_to_ptr.vmem [resolvable:$false] %s3288_s11 }
 0x11e   : > { %v2052_v51 = vsel %vm2032_vm6, %v2019_v8, %v1280_v28  ;;  %s3290_s12 = scalar_lea.vmem %s3289_s11, 32  ;;  %p3291_p0 = scmp.lt.s32.totalorder %s4581_s25, %s3289_s11 }
 0x11f   : > { %v1278_v41 = vpop.permute.xlu0 %1277  ;;  %p3292_p1 = scmp.lt.s32.totalorder %s3290_s12, %s3284_s22 }
 0x120   : > { %v2050_v2 = vsel %vm2032_vm6, %v2017_v13, %v1278_v41 }
 0x121   : > { %v1408_v63 = vpop.permute.xlu1 %1407  ;;  %p3293_p2 = por %p3292_p1, %p3291_p0 }
 0x122   : > { %v2085_v35 = vsel %vm2065_vm7, %v2052_v51, %v1408_v63 }
 0x123   : > { %v1406_v38 = vpop.permute.xlu0 %1405  ;;  %p3294_p3 = pnand %p3293_p2, %p3287_p13 }
 0x124   : > { %v2083_v56 = vsel %vm2065_vm7, %v2050_v2, %v1406_v38 }
 0x125   : > { %v1520_v58 = vpop.permute.xlu1 %1519 }
 0x126   : > { %v2118_v26 = vsel %vm2098_vm8, %v2085_v35, %v1520_v58 }
 0x127   : > { %v1518_v36 = vpop.permute.xlu0 %1517 }
 0x128   : > { %v2116_v33 = vsel %vm2098_vm8, %v2083_v56, %v1518_v36 }
 0x129   : > { %v1792_v62 = vpop.permute.xlu1 %1791 }
 0x12a   : > { %v2151_v54 = vsel %vm2131_vm9, %v2118_v26, %v1792_v62 }
 0x12b   : > { %v1790_v5 = vpop.permute.xlu0 %1789 }
 0x12c   : > { %v2149_v52 = vsel %vm2131_vm9, %v2116_v33, %v1790_v5 }
 0x12d   : > { %v769_v24 = vpop.permute.xlu1 %768 }
 0x12e   : > { %v1955_v45 = vsel %vm1933_vm3, %v3930_v9, %v769_v24 }
 0x12f   : > { %v1918_v16 = vpop.permute.xlu0 %1917 }
 0x130   : > { %v2182_v23 = vsel %vm2164_vm10, %v2149_v52, %v1918_v16 }
 0x131   : > { %3040 = vmatprep.mubr.msk.bf16.mxu0 %vm2230_vm11, %v2182_v23  ;;  %v771_v48 = vpop.permute.xlu1 %770 }
 0x132   : > { %v1957_v1 = vsel %vm1933_vm3, %v3955_v43, %v771_v48 }
 0x133   : > { %v1920_v7 = vpop.permute.xlu0 %1919 }
 0x134   : > { %v2184_v57 = vsel %vm2164_vm10, %v2151_v54, %v1920_v7 }
 0x135   : > { %3041 = vmatmul.mubr.msk.bf16.gmra.mrb[16].mxu0 %vm2230_vm11, %v2184_v57  ;;  %v900_v53 = vpop.permute.xlu1 %899 }
 0x136   : > { %v1990_v59 = vsel %vm1966_vm4, %v1957_v1, %v900_v53 }
 0x137   : > { %v898_v39 = vpop.permute.xlu0 %897 }
 0x138   : > { %v1988_v50 = vsel %vm1966_vm4, %v1955_v45, %v898_v39 }
 0x139   : > { %v1012_v34 = vpop.permute.xlu1 %1011 }
 0x13a   : > { %v2023_v9 = vsel %vm1999_vm5, %v1990_v59, %v1012_v34 }
 0x13b   : > { %v1010_v0 = vpop.permute.xlu0 %1009 }
 0x13c   : > { %v2021_v11 = vsel %vm1999_vm5, %v1988_v50, %v1010_v0 }
 0x13d   : > { %v1284_v60 = vpop.permute.xlu1 %1283 }
 0x13e   : > { %v2056_v21 = vsel %vm2032_vm6, %v2023_v9, %v1284_v60 }
 0x13f   : > { %v1282_v3 = vpop.permute.xlu0 %1281 }
 0x140   : > { %v2054_v6 = vsel %vm2032_vm6, %v2021_v11, %v1282_v3 }
 0x141   : > { %v1412_v40 = vpop.permute.xlu1 %1411 }
 0x142   : > { %v2089_v47 = vsel %vm2065_vm7, %v2056_v21, %v1412_v40 }
 0x143   : > { %v1410_v61 = vpop.permute.xlu0 %1409 }
 0x144   : > { %v2087_v4 = vsel %vm2065_vm7, %v2054_v6, %v1410_v61 }
 0x145   : > { %v1524_v25 = vpop.permute.xlu1 %1523 }
 0x146   : > { %v2122_v43 = vsel %vm2098_vm8, %v2089_v47, %v1524_v25 }
 0x147   : > { %v1522_v32 = vpop.permute.xlu0 %1521 }
 0x148   : > { %v2120_v49 = vsel %vm2098_vm8, %v2087_v4, %v1522_v32 }
 0x149   : > { %v1796_v14 = vpop.permute.xlu1 %1795 }
 0x14a   : > { %v2155_v17 = vsel %vm2131_vm9, %v2122_v43, %v1796_v14  ;;  %v4493_v14 = vld [vmem:[%s4623_s2] ss:$0 sm:$0xff] }
 0x14b   : > { %v1794_v20 = vpop.permute.xlu0 %1793 }
 0x14c   : > { %v2153_v42 = vsel %vm2131_vm9, %v2120_v49, %v1794_v20 }
 0x14d   : > { %v773_v27 = vpop.permute.xlu1 %772 }
 0x14e   : > { %v1959_v5 = vsel %vm1933_vm3, %v4077_v15, %v773_v27 }
 0x14f   : > { %v1922_v44 = vpop.permute.xlu0 %1921 }
 0x150   : > { %v2186_v37 = vsel %vm2164_vm10, %v2153_v42, %v1922_v44 }
 0x151   : > { %3044 = vmatprep.mubr.msk.bf16.mxu0 %vm2230_vm11, %v2186_v37  ;;  %v775_v29 = vpop.permute.xlu1 %774 }
 0x152   : > { %v1961_v24 = vsel %vm1933_vm3, %v4106_v10, %v775_v29 }
 0x153   : > { %v1924_v19 = vpop.permute.xlu0 %1923 }
 0x154   : > { %v2188_v31 = vsel %vm2164_vm10, %v2155_v17, %v1924_v19 }
 0x155   : > { %3045 = vmatmul.mubr.msk.bf16.gmra.mrb[20].mxu0 %vm2230_vm11, %v2188_v31  ;;  %v904_v28 = vpop.permute.xlu1 %903 }
 0x156   : > { %v1994_v52 = vsel %vm1966_vm4, %v1961_v24, %v904_v28 }
 0x157   : > { %v902_v41 = vpop.permute.xlu0 %901 }
 0x158   : > { %v1992_v2 = vsel %vm1966_vm4, %v1959_v5, %v902_v41 }
 0x159   : > { %v1016_v63 = vpop.permute.xlu1 %1015 }
 0x15a   : > { %v2027_v15 = vsel %vm1999_vm5, %v1994_v52, %v1016_v63 }
 0x15b   : > { %v1014_v38 = vpop.permute.xlu0 %1013 }
 0x15c   : > { %v2025_v56 = vsel %vm1999_vm5, %v1992_v2, %v1014_v38 }
 0x15d   : > { %v1288_v58 = vpop.permute.xlu1 %1287 }
 0x15e   : > { %v2060_v26 = vsel %vm2032_vm6, %v2027_v15, %v1288_v58 }
 0x15f   : > { %v1286_v36 = vpop.permute.xlu0 %1285 }
 0x160   : > { %v2058_v33 = vsel %vm2032_vm6, %v2025_v56, %v1286_v36 }
 0x161   : > { %v1416_v46 = vpop.permute.xlu1 %1415 }
 0x162   : > { %v2093_v54 = vsel %vm2065_vm7, %v2060_v26, %v1416_v46 }
 0x163   : > { %v1414_v55 = vpop.permute.xlu0 %1413 }
 0x164   : > { %v2091_v8 = vsel %vm2065_vm7, %v2058_v33, %v1414_v55 }
 0x165   : > { %v1528_v62 = vpop.permute.xlu1 %1527 }
 0x166   : > { %v2126_v10 = vsel %vm2098_vm8, %v2093_v54, %v1528_v62 }
 0x167   : > { %v1526_v13 = vpop.permute.xlu0 %1525 }
 0x168   : > { %v2124_v16 = vsel %vm2098_vm8, %v2091_v8, %v1526_v13 }
 0x169   : > { %v1800_v22 = vpop.permute.xlu1 %1799 }
 0x16a   : > { %v2159_v57 = vsel %vm2131_vm9, %v2126_v10, %v1800_v22 }
 0x16b   : > { %v1798_v18 = vpop.permute.xlu0 %1797 }
 0x16c   : > { %v2157_v23 = vsel %vm2131_vm9, %v2124_v16, %v1798_v18 }
 0x16d   : > { %v777_v51 = vpop.permute.xlu1 %776 }
 0x16e   : > { %v1963_v11 = vsel %vm1933_vm3, %v4242_v30, %v777_v51 }
 0x16f   : > { %v1926_v35 = vpop.permute.xlu0 %1925 }
 0x170   : > { %v2190_v48 = vsel %vm2164_vm10, %v2157_v23, %v1926_v35 }
 0x171   : > { %3048 = vmatprep.mubr.msk.bf16.mxu0 %vm2230_vm11, %v2190_v48  ;;  %v779_v7 = vpop.permute.xlu1 %778 }
 0x172   : > { %v1965_v20 = vsel %vm1933_vm3, %v4272_v12, %v779_v7 }
 0x173   : > { %v1928_v53 = vpop.permute.xlu0 %1927 }
 0x174   : > { %v2192_v39 = vsel %vm2164_vm10, %v2159_v57, %v1928_v53 }
 0x175   : > { %3049 = vmatmul.mubr.msk.bf16.gmra.mrb[24].mxu0 %vm2230_vm11, %v2192_v39  ;;  %v908_v34 = vpop.permute.xlu1 %907 }
 0x176   : > { %v1998_v1 = vsel %vm1966_vm4, %v1965_v20, %v908_v34 }
 0x177   : > { %v906_v0 = vpop.permute.xlu0 %905 }
 0x178   : > { %v1996_v4 = vsel %vm1966_vm4, %v1963_v11, %v906_v0 }
 0x179   : > { %v1020_v60 = vpop.permute.xlu1 %1019 }
 0x17a   : > { %v2031_v49 = vsel %vm1999_vm5, %v1998_v1, %v1020_v60  ;;  %v3276_v1 = vld [vmem:[%s4624_s3] sm:$0xff]  }
 0x17b   : > { %v1018_v3 = vpop.permute.xlu0 %1017 }
 0x17c   : > { %v2029_v27 = vsel %vm1999_vm5, %v1996_v4, %v1018_v3  ;;  %v3356_v4 = vmov 0.0  }
 0x17d   : > { %v1292_v40 = vpop.permute.xlu1 %1291  ;;  %3056 = vmatprep.subr.bf16.mxu1 %v3356_v4  ;;  %3072 = vmatprep.mubr.msk.bf16.mxu1 %vm3357_vm12, %v3356_v4 }
 0x17e   : > { %v2064_v21 = vsel %vm2032_vm6, %v2031_v49, %v1292_v40  ;;  %3057 = vmatpush3.bf16.msra.mxu1 %v3276_v1  ;;  %v3277_v49 = vld [vmem:[%s4624_s3 + $0x8] sm:$0xff]  }
 0x17f   : > { %v1290_v61 = vpop.permute.xlu0 %1289  ;;  %3058 = vmatprep.subr.bf16.mxu1 %v3356_v4 }
 0x180   : > { %v2062_v30 = vsel %vm2032_vm6, %v2029_v27, %v1290_v61 }
 0x181   : > { %v1420_v25 = vpop.permute.xlu1 %1419 }
 0x182   : > { %v2097_v47 = vsel %vm2065_vm7, %v2064_v21, %v1420_v25  ;;  %3059 = vmatpush3.bf16.msra.mxu1 %v3277_v49  ;;  %v3278_v21 = vld [vmem:[%s4624_s3 + $0x10] sm:$0xff]  }
 0x183   : > { %v1418_v32 = vpop.permute.xlu0 %1417  ;;  %3060 = vmatprep.subr.bf16.mxu1 %v3356_v4 }
 0x184   : > { %v2095_v43 = vsel %vm2065_vm7, %v2062_v30, %v1418_v32 }
 0x185   : > { %v1532_v45 = vpop.permute.xlu1 %1531 }
 0x186   : > { %v2130_v19 = vsel %vm2098_vm8, %v2097_v47, %v1532_v45  ;;  %3061 = vmatpush3.bf16.msra.mxu1 %v3278_v21 }
 0x187   : > { %v1530_v50 = vpop.permute.xlu0 %1529  ;;  %3062 = vmatprep.subr.bf16.mxu1 %v3356_v4 }
 0x188   : > { %v3026_v6 = vpop.f32.mrb[0].mxu0  ;;  %v2128_v31 = vsel %vm2098_vm8, %v2095_v43, %v1530_v50 }
 0x189   : > { %v2301_v59 = vpop.f32.mrb[1].mxu0  ;;  %v1804_v44 = vpop.permute.xlu1 %1803  ;;  %v2310_v29 = vadd.f32 %v3026_v6, %v4493_v14 }
 0x18a   : > { %v2302_v9 = vadd.f32 %v4493_v14, %v2301_v59  ;;  %v3027_v42 = vpop.f32.mrb[2].mxu0  ;;  %v2163_v63 = vsel %vm2131_vm9, %v2130_v19, %v1804_v44  ;;  %v3279_v19 = vld [vmem:[%s4624_s3 + $0x18] sm:$0xff]  }
 0x18b   : > { %v2304_v37 = vpop.f32.mrb[3].mxu0  ;;  %v1802_v12 = vpop.permute.xlu0 %1801  ;;  %v2313_v41 = vadd.f32 %v3027_v42, %v4493_v14  ;;  %v2430_v62 = vmax.f32 %v2310_v29, 0.0  ;;  %3063 = vmatpush3.bf16.msra.mxu1 %v3279_v19 }
 0x18c   : > { %v2305_v17 = vadd.f32 %v4493_v14, %v2304_v37  ;;  %v2428_v28 = vmax.f32 %v2302_v9, 0.0  ;;  %v2161_v36 = vsel %vm2131_vm9, %v2128_v31, %v1802_v12  ;;  %3064 = vmatprep.subr.bf16.mxu1 %v3356_v4 }
 0x18d   : > { %v1932_v58 = vpop.permute.xlu1 %1931  ;;  %v2431_v2 = vmax.f32 %v2313_v41, 0.0 }
 0x18e   : > { %v2429_v38 = vmax.f32 %v2305_v17, 0.0  ;;  %v2196_v46 = vsel %vm2164_vm10, %v2163_v63, %v1932_v58 }
 0x18f   : > { %v1930_v55 = vpop.permute.xlu0 %1929 }
 0x190   : > { %v2460_v13 = vadd.f32 %v2429_v38, %v2428_v28  ;;  %v2194_v5 = vsel %vm2164_vm10, %v2161_v36, %v1930_v55  ;;  %v3280_v38 = vld [vmem:[%s4624_s3 + $0x20] sm:$0xff]   ;;  %v3281_v36 = vld [vmem:[%s4624_s3 + $0x28] sm:$0xff]   ;;  %v3283_v55 = vld [vmem:[%s4624_s3 + $0x38] sm:$0xff]  }
 0x191   : > { %3052 = vmatprep.mubr.msk.bf16.mxu0 %vm2230_vm11, %v2194_v5  ;;  %3065 = vmatpush3.bf16.msra.mxu1 %v3280_v38 }
 0x192   : > { %v2461_v22 = vadd.f32 %v2460_v13, %v2430_v62  ;;  %3053 = vmatmul.mubr.msk.bf16.gmra.mrb[28].mxu0 %vm2230_vm11, %v2196_v46  ;;  %3066 = vmatprep.subr.bf16.mxu1 %v3356_v4  ;;  %v3282_v46 = vld [vmem:[%s4624_s3 + $0x30] sm:$0xff]  }
 0x194   : > { %v2462_v56 = vadd.f32 %v2461_v22, %v2431_v2 }
 0x195   : > { %3067 = vmatpush3.bf16.msra.mxu1 %v3281_v36 }
 0x196   : > { %3068 = vmatprep.subr.bf16.mxu1 %v3356_v4 }
 0x199   : > { %3069 = vmatpush3.bf16.msra.mxu1 %v3282_v46 }
 0x19a   : > { %3070 = vmatprep.subr.bf16.mxu1 %v3356_v4 }
 0x19d   : > { %3071 = vmatpush3.bf16.msra.mxu1 %v3283_v55 }
 0x1a8   : > { %v3030_v18 = vpop.f32.mrb[4].mxu0 }
 0x1a9   : > { %v2317_v33 = vpop.f32.mrb[5].mxu0  ;;  %v2326_v16 = vadd.f32 %v3030_v18, %v4493_v14 }
 0x1aa   : > { %v2318_v24 = vadd.f32 %v4493_v14, %v2317_v33  ;;  %v3031_v8 = vpop.f32.mrb[6].mxu0 }
 0x1ab   : > { %v2320_v52 = vpop.f32.mrb[7].mxu0  ;;  %v2329_v35 = vadd.f32 %v3031_v8, %v4493_v14  ;;  %v2434_v48 = vmax.f32 %v2326_v16, 0.0 }
 0x1ac   : > { %v2432_v51 = vmax.f32 %v2318_v24, 0.0  ;;  %v2321_v15 = vadd.f32 %v4493_v14, %v2320_v52 }
 0x1ad   : > { %v2435_v10 = vmax.f32 %v2329_v35, 0.0 }
 0x1ae   : > { %v2463_v23 = vadd.f32 %v2462_v56, %v2432_v51  ;;  %v2433_v26 = vmax.f32 %v2321_v15, 0.0 }
 0x1b0   : > { %v2464_v54 = vadd.f32 %v2463_v23, %v2433_v26 }
 0x1b2   : > { %v2465_v7 = vadd.f32 %v2464_v54, %v2434_v48 }
 0x1b4   : > { %v2466_v57 = vadd.f32 %v2465_v7, %v2435_v10 }
 0x1c8   : > { %v3034_v53 = vpop.f32.mrb[8].mxu0 }
 0x1c9   : > { %v2333_v39 = vpop.f32.mrb[9].mxu0  ;;  %v2342_v3 = vadd.f32 %v3034_v53, %v4493_v14 }
 0x1ca   : > { %v2334_v34 = vadd.f32 %v4493_v14, %v2333_v39  ;;  %v3035_v0 = vpop.f32.mrb[10].mxu0 }
 0x1cb   : > { %v2336_v60 = vpop.f32.mrb[11].mxu0  ;;  %v2345_v32 = vadd.f32 %v3035_v0, %v4493_v14  ;;  %v2438_v50 = vmax.f32 %v2342_v3, 0.0 }
 0x1cc   : > { %v2436_v40 = vmax.f32 %v2334_v34, 0.0  ;;  %v2337_v61 = vadd.f32 %v4493_v14, %v2336_v60 }
 0x1cd   : > { %v2439_v20 = vmax.f32 %v2345_v32, 0.0 }
 0x1ce   : > { %v2467_v25 = vadd.f32 %v2466_v57, %v2436_v40  ;;  %v2437_v45 = vmax.f32 %v2337_v61, 0.0 }
 0x1d0   : > { %v2468_v11 = vadd.f32 %v2467_v25, %v2437_v45 }
 0x1d2   : > { %v2469_v6 = vadd.f32 %v2468_v11, %v2438_v50 }
 0x1d4   : > { %v2470_v59 = vadd.f32 %v2469_v6, %v2439_v20 }
 0x1e8   : > { %v3038_v27 = vpop.f32.mrb[12].mxu0 }
 0x1e9   : > { %v2349_v9 = vpop.f32.mrb[13].mxu0  ;;  %v2358_v37 = vadd.f32 %v3038_v27, %v4493_v14 }
 0x1ea   : > { %v2350_v42 = vadd.f32 %v4493_v14, %v2349_v9  ;;  %v3039_v44 = vpop.f32.mrb[14].mxu0 }
 0x1eb   : > { %v2352_v30 = vpop.f32.mrb[15].mxu0  ;;  %v2361_v29 = vadd.f32 %v3039_v44, %v4493_v14  ;;  %v2442_v31 = vmax.f32 %v2358_v37, 0.0 }
 0x1ec   : > { %v2440_v12 = vmax.f32 %v2350_v42, 0.0  ;;  %v2353_v47 = vadd.f32 %v4493_v14, %v2352_v30 }
 0x1ed   : > { %v2443_v41 = vmax.f32 %v2361_v29, 0.0 }
 0x1ee   : > { %v2471_v43 = vadd.f32 %v2470_v59, %v2440_v12  ;;  %v2441_v17 = vmax.f32 %v2353_v47, 0.0 }
 0x1f0   : > { %v2472_v28 = vadd.f32 %v2471_v43, %v2441_v17 }
 0x1f2   : > { %v2473_v63 = vadd.f32 %v2472_v28, %v2442_v31 }
 0x1f4   : > { %v2474_v58 = vadd.f32 %v2473_v63, %v2443_v41 }
 0x208   : > { %v3042_v62 = vpop.f32.mrb[16].mxu0 }
 0x209   : > { %v2365_v13 = vpop.f32.mrb[17].mxu0  ;;  %v2374_v56 = vadd.f32 %v3042_v62, %v4493_v14 }
 0x20a   : > { %v2366_v5 = vadd.f32 %v4493_v14, %v2365_v13  ;;  %v3043_v2 = vpop.f32.mrb[18].mxu0 }
 0x20b   : > { %v2368_v22 = vpop.f32.mrb[19].mxu0  ;;  %v2377_v8 = vadd.f32 %v3043_v2, %v4493_v14  ;;  %v2446_v16 = vmax.f32 %v2374_v56, 0.0 }
 0x20c   : > { %v2444_v18 = vmax.f32 %v2366_v5, 0.0  ;;  %v2369_v33 = vadd.f32 %v4493_v14, %v2368_v22 }
 0x20d   : > { %v2447_v15 = vmax.f32 %v2377_v8, 0.0 }
 0x20e   : > { %v2475_v24 = vadd.f32 %v2474_v58, %v2444_v18  ;;  %v2445_v52 = vmax.f32 %v2369_v33, 0.0 }
 0x210   : > { %v2476_v51 = vadd.f32 %v2475_v24, %v2445_v52 }
 0x212   : > { %v2477_v23 = vadd.f32 %v2476_v51, %v2446_v16 }
 0x214   : > { %v2478_v35 = vadd.f32 %v2477_v23, %v2447_v15 }
 0x228   : > { %v3046_v26 = vpop.f32.mrb[20].mxu0 }
 0x229   : > { %v2381_v48 = vpop.f32.mrb[21].mxu0  ;;  %v2390_v57 = vadd.f32 %v3046_v26, %v4493_v14 }
 0x22a   : > { %v2382_v54 = vadd.f32 %v4493_v14, %v2381_v48  ;;  %v3047_v10 = vpop.f32.mrb[22].mxu0 }
 0x22b   : > { %v2384_v7 = vpop.f32.mrb[23].mxu0  ;;  %v2393_v0 = vadd.f32 %v3047_v10, %v4493_v14  ;;  %v2450_v3 = vmax.f32 %v2390_v57, 0.0 }
 0x22c   : > { %v2448_v53 = vmax.f32 %v2382_v54, 0.0  ;;  %v2385_v39 = vadd.f32 %v4493_v14, %v2384_v7 }
 0x22d   : > { %v2451_v61 = vmax.f32 %v2393_v0, 0.0 }
 0x22e   : > { %v2479_v34 = vadd.f32 %v2478_v35, %v2448_v53  ;;  %v2449_v60 = vmax.f32 %v2385_v39, 0.0 }
 0x230   : > { %v2480_v40 = vadd.f32 %v2479_v34, %v2449_v60 }
 0x232   : > { %v2481_v25 = vadd.f32 %v2480_v40, %v2450_v3 }
 0x234   : > { %v2482_v32 = vadd.f32 %v2481_v25, %v2451_v61 }
 0x248   : > { %v3050_v45 = vpop.f32.mrb[24].mxu0 }
 0x249   : > { %v2397_v50 = vpop.f32.mrb[25].mxu0  ;;  %v2406_v1 = vadd.f32 %v3050_v45, %v4493_v14 }
 0x24a   : > { %v2398_v11 = vadd.f32 %v4493_v14, %v2397_v50  ;;  %v3051_v20 = vpop.f32.mrb[26].mxu0 }
 0x24b   : > { %v2400_v6 = vpop.f32.mrb[27].mxu0  ;;  %v2409_v27 = vadd.f32 %v3051_v20, %v4493_v14  ;;  %v2454_v42 = vmax.f32 %v2406_v1, 0.0 }
 0x24c   : > { %v2452_v4 = vmax.f32 %v2398_v11, 0.0  ;;  %v2401_v59 = vadd.f32 %v4493_v14, %v2400_v6 }
 0x24d   : > { %v2455_v21 = vmax.f32 %v2409_v27, 0.0 }
 0x24e   : > { %v2483_v49 = vadd.f32 %v2482_v32, %v2452_v4  ;;  %v2453_v9 = vmax.f32 %v2401_v59, 0.0 }
 0x250   : > { %v2484_v44 = vadd.f32 %v2483_v49, %v2453_v9 }
 0x252   : > { %v2485_v30 = vadd.f32 %v2484_v44, %v2454_v42 }
 0x254   : > { %v2486_v37 = vadd.f32 %v2485_v30, %v2455_v21 }
 0x265   : > { %v3054_v12 = vpop.f32.mrb[28].mxu0 }
 0x266   : > { %v2413_v47 = vpop.f32.mrb[29].mxu0  ;;  %v2422_v19 = vadd.f32 %v3054_v12, %v4493_v14 }
 0x267   : > { %v2414_v43 = vadd.f32 %v4493_v14, %v2413_v47  ;;  %v3055_v29 = vpop.f32.mrb[30].mxu0 }
 0x268   : > { %v2416_v17 = vpop.f32.mrb[31].mxu0  ;;  %v2425_v63 = vadd.f32 %v3055_v29, %v4493_v14  ;;  %v2458_v58 = vmax.f32 %v2422_v19, 0.0 }
 0x269   : > { %v2456_v31 = vmax.f32 %v2414_v43, 0.0  ;;  %v2417_v28 = vadd.f32 %v4493_v14, %v2416_v17  ;;  %v2516_v14 = vld [vmem:[%s4625_s4] sm:$0x1] }
 0x26a   : > { %v2459_v46 = vmax.f32 %v2425_v63, 0.0 }
 0x26b   : > { %v2487_v41 = vadd.f32 %v2486_v37, %v2456_v31  ;;  %v2457_v38 = vmax.f32 %v2417_v28, 0.0 }
 0x26d   : > { %v2488_v36 = vadd.f32 %v2487_v41, %v2457_v38 }
 0x26f   : > { %v2489_v55 = vadd.f32 %v2488_v36, %v2458_v58 }
 0x271   : > { %v2490_v62 = vadd.f32 %v2489_v55, %v2459_v46 }
 0x273   : > { %v2491_v13 = vrot.slane %v2490_v62, 4 }
 0x275   : > { %v2492_v5 = vadd.f32 %v2491_v13, %v2490_v62 }
 0x277   : > { %v2493_v2 = vrot.slane %v2492_v5, 2 }
 0x279   : > { %v2494_v22 = vadd.f32 %v2493_v2, %v2492_v5 }
 0x27b   : > { %v2495_v56 = vrot.slane %v2494_v22, 1 }
 0x27d   : > { %v2496_v18 = vadd.f32 %v2495_v56, %v2494_v22 }
 0x27f   : > { %v2498_v33 = vmul.f32 0.00390625, %v2496_v18 }
 0x281   : > { %v2499_v24 = vpack.c.bf16 %v2498_v33, %v2498_v33 }
 0x283   : > { %3073 = vmatmul.mubr.bf16.vlgmr.msra.gmra.mrb[0].mxu1 %v2499_v24 }
 0x356   : > { %v2599_v8 = vpop.f32.mrb[0].mxu1 }
 0x357   : > { %v2600_v52 = vadd.f32 %v2599_v8, %v2516_v14  ;;  %v3074_v16 = vpop.f32.mrb[1].mxu1 }
 0x358   : > { %v2602_v51 = vpop.f32.mrb[2].mxu1 }
 0x359   : > { %2605 = vst [vmem:[%s216_s23] sm:$0x1] %v2600_v52  ;;  %v3075_v15 = vpop.f32.mrb[3].mxu1 }
 0x35a   : > { %3297 = shalt.err (!%p3294_p3)
}
 0x35b   : > { %s3298_s15 = scalar_lea.hbm %s4579_s6, 16  ;;  %s3302_s13 = scalar_lea.hbm %s4626_s5, 32 }
 0x35c   : > { %p3299_p4 = scmp.ne.s32.totalorder %s4579_s6, %s3298_s15  ;;  %p3303_p9 = scmp.lt.u32.totalorder %s4579_s6, %s4626_s5 }
 0x35d   : > { %p3304_p10 = scmp.lt.u32.totalorder %s3302_s13, %s3298_s15  ;;  %p3306_p12 = scmp.lt.u32.totalorder %s3298_s15, %s4579_s6 }
 0x35e   : > { %p3300_p7 = pnand %p3299_p4, %p3427_p5 }
 0x35f   : > { %p3305_p11 = por %p3304_p10, %p3303_p9 }
 0x360   : > { %p3301_p8 = pneg %p3300_p7 }
 0x361   : > { %p3307_p13 = por %p3306_p12, %p3305_p11 }
 0x363   : > { %p3308_p0 = pnand %p3307_p13, %p3301_p8 }
 0x365   : > { %3311 = shalt.err (!%p3308_p0)
}
 0x366   : > { %3078 = dma.vmem_to_hbm [thread:$0]  (%p3427_p5), %s4581_s25, 16, %s4579_s6, %s2607_s7  }
 0x367 PF: > { %p3084_p1 = scmp.ge.s32.totalorder %s3346_s21, 2  ;;  %s2631_s17 = sand.u32 1, %s3334_s18  }
 0x368   : > { %s2632_s23 = scalar_lea.sflag [#allocation3], %s2631_s17 }
 0x369   : > { %p3081_p2 = pnand %p3084_p1, %p3431_p6 }
 0x36b   : > { %3329 = dma.done.wait (!%p3081_p2), %s2632_s23, 16  }
 0x36c   : > { %3331 = vsyncadd (!%p3081_p2), %s2632_s23, 4294967280  ;;  %p15_p3 = scmp.ge.s32.totalorder %s3414_s24, 4   ;;  %s4629_s18 = smov %s3338_s19 }
 0x36d   : > { %s4630_s19 = smov %s3342_s20  ;;  %s4631_s20 = smov %s3425_s27 }
 0x36e   : > { %s4632_s21 = smov %s3414_s24  ;;  %17 = sbr.rel (!%p15_p3) target bundleno = 3 (0x3), region = 77 }
 0x375   :  { %2636 = vsyncpa [#allocation3], 1 }
 0x376   :  { %2638 = vsyncpa [#allocation3 + $0x1], 1 }

</bundles_post_ra>
